<compile_context>
chip_gen: v7x
topology: tpu7x:2x2x1
jax: 0.10.0
libtpu: 0.0.40
codegen_flags: <defaults>
</compile_context>

<pallas_src>
import functools

import jax
import jax.numpy as jnp
import numpy as np
from jax import lax
from jax.experimental import pallas as pl
from jax.experimental.pallas import tpu as pltpu


# ----------------------------------------------------------------------------
# Pallas kernel: full encoder time loop + L-step decoder (single grid point)
# ----------------------------------------------------------------------------
def lstm_ae_cho_kernel(*refs, seq_len, n_layers, hidden, feat):
    H, F = hidden, feat

    # ------- unpack refs (order matches wrapper packing) -------
    idx = 0
    x_ref = refs[idx]; idx += 1
    w_ih0_ref, w_hh0_ref, b0_ref = refs[idx], refs[idx + 1], refs[idx + 2]
    idx += 3
    enc_refs = []
    for _ in range(1, n_layers):
        enc_refs.append((refs[idx], refs[idx + 1])); idx += 2
    dec_refs = []
    for _ in range(n_layers):
        dec_refs.append((refs[idx], refs[idx + 1])); idx += 2
    out_ref = refs[idx]

    # gate order is [i | f | o | g]: sigmoid on first 3*hid lanes, tanh on last hid
    sig_mask_e = lax.broadcasted_iota(jnp.int32, (1, 4 * H), 1) < 3 * H
    sig_mask_d = lax.broadcasted_iota(jnp.int32, (1, 4 * F), 1) < 3 * F

    def gate_act(gates, hid, mask):
        # full-width EUP ops, static lane-mask select; then static lane slices
        act = jnp.where(mask, jax.nn.sigmoid(gates), jnp.tanh(gates))
        return (act[:, 0:hid], act[:, hid:2 * hid],
                act[:, 2 * hid:3 * hid], act[:, 3 * hid:4 * hid])  # i, f, o, g

    # ------------------------------ encoder ------------------------------
    # hoist weight / bias loads out of the unrolled time loop
    w_hh0 = w_hh0_ref[...]
    enc_w = [(w[...], b[...]) for (w, b) in enc_refs]

    # layer-0 input projection for ALL timesteps: one (T,F)@(F,4H) MXU pass
    xproj = (jnp.dot(x_ref[...], w_ih0_ref[...],
                     preferred_element_type=jnp.float32) + b0_ref[...])

    hs = [jnp.zeros((1, H), jnp.float32) for _ in range(n_layers)]
    cs = [jnp.zeros((1, H), jnp.float32) for _ in range(n_layers)]
    for t in range(seq_len):                         # static unroll
        # layer 0: only the recurrent matmul remains on the critical path
        g0 = xproj[t:t + 1, :] + jnp.dot(hs[0], w_hh0,
                                         preferred_element_type=jnp.float32)
        i, f, o, g = gate_act(g0, H, sig_mask_e)
        cs[0] = f * cs[0] + i * g
        hs[0] = o * jnp.tanh(cs[0])
        # layers >= 1: fused (input | hidden) single matmul per cell
        for l in range(1, n_layers):
            w_cat, b_l = enc_w[l - 1]
            inp_cat = jnp.concatenate([hs[l - 1], hs[l]], axis=1)   # (1, 2H)
            gl = jnp.dot(inp_cat, w_cat, preferred_element_type=jnp.float32) + b_l
            i, f, o, g = gate_act(gl, H, sig_mask_e)
            cs[l] = f * cs[l] + i * g
            hs[l] = o * jnp.tanh(cs[l])

    # ------------------------------ decoder ------------------------------
    # n_layers "timesteps" whose inputs are the encoder final hiddens hs[0..L-1];
    # decoder hidden size == n_features, zero initial state.
    dec_w = [(w[...], b[...]) for (w, b) in dec_refs]
    hd = [jnp.zeros((1, F), jnp.float32) for _ in range(n_layers)]
    cd = [jnp.zeros((1, F), jnp.float32) for _ in range(n_layers)]
    for s in range(n_layers):                        # static unroll
        inp = hs[s]
        for l in range(n_layers):
            w_cat, b_l = dec_w[l]
            in_l = H if l == 0 else F
            if s == 0:
                # zero state: h=0 -> skip recurrent matmul; c=0 -> c_new = i*g
                gl = jnp.dot(inp, w_cat[:in_l, :],
                             preferred_element_type=jnp.float32) + b_l
                i, f, o, g = gate_act(gl, F, sig_mask_d)
                cd[l] = i * g
            else:
                inp_cat = jnp.concatenate([inp, hd[l]], axis=1)     # (1, in_l+F)
                gl = jnp.dot(inp_cat, w_cat,
                             preferred_element_type=jnp.float32) + b_l
                i, f, o, g = gate_act(gl, F, sig_mask_d)
                cd[l] = f * cd[l] + i * g
            hd[l] = o * jnp.tanh(cd[l])
            inp = hd[l]
        out_ref[s:s + 1, :] = inp        # x_hat[s] = top-layer hidden at step s


# ----------------------------------------------------------------------------
# parameter init: PyTorch-layout raw weights, uniform(-1/sqrt(H), 1/sqrt(H)),
# gate order [i, f, g, o]  (kept raw so the reference is an independent check)
# ----------------------------------------------------------------------------
def init_torch_lstm_params(key, n_layers, input_size, hidden_size):
    ks = jax.random.split(key, n_layers * 4)
    scale = 1.0 / float(np.sqrt(hidden_size))
    params = []
    for l in range(n_layers):
        in_l = input_size if l == 0 else hidden_size
        k1, k2, k3, k4 = ks[4 * l:4 * l + 4]
        w_ih = jax.random.uniform(k1, (4 * hidden_size, in_l), jnp.float32, -scale, scale)
        w_hh = jax.random.uniform(k2, (4 * hidden_size, hidden_size), jnp.float32, -scale, scale)
        b_ih = jax.random.uniform(k3, (4 * hidden_size,), jnp.float32, -scale, scale)
        b_hh = jax.random.uniform(k4, (4 * hidden_size,), jnp.float32, -scale, scale)
        params.append((w_ih, w_hh, b_ih, b_hh))
    return params


# ----------------------------------------------------------------------------
# wrapper: repack PyTorch-layout weights for the kernel
#   - reorder gate blocks [i,f,g,o] -> [i,f,o,g]
#   - transpose to (in, 4*hid) for right-multiplication
#   - fuse W_ih / W_hh into one (in+hid, 4*hid) stacked weight (except enc layer 0,
#     whose input projection is batched over time inside the kernel)
#   - fold b_ih + b_hh into a single (1, 4*hid) bias
# ----------------------------------------------------------------------------
def lstm_autoencoder_cho_forward(x, enc_params, dec_params, *,
                                 n_features, hidden_size, n_layers):
    T, B, F = x.shape
    assert B == 1 and F == n_features
    H = hidden_size

    def reorder(w, hid):
        return jnp.concatenate(
            [w[0:hid], w[hid:2 * hid], w[3 * hid:4 * hid], w[2 * hid:3 * hid]],
            axis=0)                                   # [i, f, o, g]

    args = [x[:, 0, :].astype(jnp.float32)]           # (T, F)

    # encoder layer 0 (kept un-fused: input projection is hoisted across time)
    w_ih0, w_hh0, b_ih0, b_hh0 = enc_params[0]
    args.append(reorder(w_ih0, H).T)                                   # (F, 4H)
    args.append(reorder(w_hh0, H).T)                                   # (H, 4H)
    args.append((reorder(b_ih0, H) + reorder(b_hh0, H))[None, :])      # (1, 4H)
    # encoder layers >= 1: fused weights
    for l in range(1, n_layers):
        w_ih, w_hh, b_ih, b_hh = enc_params[l]
        args.append(jnp.concatenate([reorder(w_ih, H).T,
                                     reorder(w_hh, H).T], axis=0))     # (2H, 4H)
        args.append((reorder(b_ih, H) + reorder(b_hh, H))[None, :])    # (1, 4H)
    # decoder layers: fused weights
    for l in range(n_layers):
        w_ih, w_hh, b_ih, b_hh = dec_params[l]
        args.append(jnp.concatenate([reorder(w_ih, F).T,
                                     reorder(w_hh, F).T], axis=0))     # (in_l+F, 4F)
        args.append((reorder(b_ih, F) + reorder(b_hh, F))[None, :])    # (1, 4F)

    kernel = functools.partial(lstm_ae_cho_kernel, seq_len=T,
                               n_layers=n_layers, hidden=H, feat=F)
    vmem = pl.BlockSpec(memory_space=pltpu.MemorySpace.VMEM)
    out = pl.pallas_call(
        kernel,
        out_shape=jax.ShapeDtypeStruct((n_layers, F), jnp.float32),
        in_specs=[vmem] * len(args),
        out_specs=vmem,
    )(*args)
    return out[:, None, :]                            # (n_layers, 1, F)


# ----------------------------------------------------------------------------
# independent pure-JAX reference (raw PyTorch weight layout, standard gate
# order, no fusion / reordering / hoisting) -> checks kernel packing fidelity
# ----------------------------------------------------------------------------
def _torch_lstm_ref(x_seq, layer_params, hidden_size):
    T = x_seq.shape[0]
    L = len(layer_params)
    H = hidden_size
    h = [jnp.zeros((H,), jnp.float32) for _ in range(L)]
    c = [jnp.zeros((H,), jnp.float32) for _ in range(L)]
    outs = []
    for t in range(T):
        inp = x_seq[t]
        for l, (w_ih, w_hh, b_ih, b_hh) in enumerate(layer_params):
            gates = w_ih @ inp + w_hh @ h[l] + b_ih + b_hh
            i = jax.nn.sigmoid(gates[0:H])
            f = jax.nn.sigmoid(gates[H:2 * H])
            g = jnp.tanh(gates[2 * H:3 * H])
            o = jax.nn.sigmoid(gates[3 * H:4 * H])
            c[l] = f * c[l] + i * g
            h[l] = o * jnp.tanh(c[l])
            inp = h[l]
        outs.append(inp)
    return jnp.stack(outs), jnp.stack(h)


def reference_forward(x, enc_params, dec_params, *, hidden_size, n_features):
    x_seq = x[:, 0, :]                                              # (T, F)
    _, h_enc = _torch_lstm_ref(x_seq, enc_params, hidden_size)      # (L, H)
    x_hat, _ = _torch_lstm_ref(h_enc, dec_params, n_features)       # (L, F)
    return x_hat[:, None, :]                                        # (L, 1, F)


# ----------------------------------------------------------------------------
if __name__ == "__main__":
    n_features, hidden_size, n_layers, seq_len = 4, 32, 2, 8

    key = jax.random.PRNGKey(0)
    k_x, k_e, k_d = jax.random.split(key, 3)

    # x: (T, B=1, F) time-major, matching batch_first=False
    x = jax.random.normal(k_x, (seq_len, 1, n_features), jnp.float32)
    enc_params = init_torch_lstm_params(k_e, n_layers, n_features, hidden_size)
    dec_params = init_torch_lstm_params(k_d, n_layers, hidden_size, n_features)

    out = lstm_autoencoder_cho_forward(
        x, enc_params, dec_params,
        n_features=n_features, hidden_size=hidden_size, n_layers=n_layers)
    out = jax.block_until_ready(out)

    ref = reference_forward(x, enc_params, dec_params,
                            hidden_size=hidden_size, n_features=n_features)
    ref = jax.block_until_ready(ref)

    assert out.shape == (n_layers, 1, n_features)
    np.testing.assert_allclose(np.asarray(out), np.asarray(ref),
                               rtol=1e-3, atol=1e-3)
    print("KERNEL_OK")
</pallas_src>

<mosaic_0001>
module attributes {stable_mosaic.version = 11 : i64} {
  func.func @lstm_ae_cho_kernel(%arg0: memref<8x4xf32, #tpu.memory_space<vmem>>, %arg1: memref<4x128xf32, #tpu.memory_space<vmem>>, %arg2: memref<32x128xf32, #tpu.memory_space<vmem>>, %arg3: memref<1x128xf32, #tpu.memory_space<vmem>>, %arg4: memref<64x128xf32, #tpu.memory_space<vmem>>, %arg5: memref<1x128xf32, #tpu.memory_space<vmem>>, %arg6: memref<36x16xf32, #tpu.memory_space<vmem>>, %arg7: memref<1x16xf32, #tpu.memory_space<vmem>>, %arg8: memref<8x16xf32, #tpu.memory_space<vmem>>, %arg9: memref<1x16xf32, #tpu.memory_space<vmem>>, %arg10: memref<2x4xf32, #tpu.memory_space<vmem>>) attributes {dimension_semantics = [], scalar_prefetch = 0 : i64, scratch_operands = 0 : i64, tpu.core_type = #tpu.core_type<tc>} {
    %0 = tpu.iota {dimensions = array<i32: 1>} : vector<1x128xi32>
    %c96_i32 = arith.constant 96 : i32
    %1 = vector.broadcast %c96_i32 : i32 to vector<1x128xi32>
    %2 = arith.cmpi slt, %0, %1 : vector<1x128xi32>
    %3 = tpu.iota {dimensions = array<i32: 1>} : vector<1x16xi32>
    %c12_i32 = arith.constant 12 : i32
    %4 = vector.broadcast %c12_i32 : i32 to vector<1x16xi32>
    %5 = arith.cmpi slt, %3, %4 : vector<1x16xi32>
    %c0 = arith.constant 0 : index
    %c0_0 = arith.constant 0 : index
    %6 = vector.load %arg2[%c0, %c0_0] : memref<32x128xf32, #tpu.memory_space<vmem>>, vector<32x128xf32>
    %c0_1 = arith.constant 0 : index
    %c0_2 = arith.constant 0 : index
    %7 = vector.load %arg4[%c0_1, %c0_2] : memref<64x128xf32, #tpu.memory_space<vmem>>, vector<64x128xf32>
    %c0_3 = arith.constant 0 : index
    %c0_4 = arith.constant 0 : index
    %8 = vector.load %arg5[%c0_3, %c0_4] : memref<1x128xf32, #tpu.memory_space<vmem>>, vector<1x128xf32>
    %c0_5 = arith.constant 0 : index
    %c0_6 = arith.constant 0 : index
    %9 = vector.load %arg0[%c0_5, %c0_6] : memref<8x4xf32, #tpu.memory_space<vmem>>, vector<8x4xf32>
    %c0_7 = arith.constant 0 : index
    %c0_8 = arith.constant 0 : index
    %10 = vector.load %arg1[%c0_7, %c0_8] : memref<4x128xf32, #tpu.memory_space<vmem>>, vector<4x128xf32>
    %cst = arith.constant dense<0.000000e+00> : vector<8x128xf32>
    %11 = tpu.matmul %9, %10, %cst {dimension_numbers = #tpu.dot_dimension_numbers<[1], [0], [0], [1], [0, 0, 1, 1], [], []>} : vector<8x4xf32>, vector<4x128xf32>, vector<8x128xf32> -> vector<8x128xf32>
    %c0_9 = arith.constant 0 : index
    %c0_10 = arith.constant 0 : index
    %12 = vector.load %arg3[%c0_9, %c0_10] : memref<1x128xf32, #tpu.memory_space<vmem>>, vector<1x128xf32>
    %13 = vector.broadcast %12 : vector<1x128xf32> to vector<8x128xf32>
    %14 = arith.addf %11, %13 : vector<8x128xf32>
    %cst_11 = arith.constant 0.000000e+00 : f32
    %15 = vector.broadcast %cst_11 : f32 to vector<1x32xf32>
    %cst_12 = arith.constant 0.000000e+00 : f32
    %16 = vector.broadcast %cst_12 : f32 to vector<1x32xf32>
    %cst_13 = arith.constant 0.000000e+00 : f32
    %17 = vector.broadcast %cst_13 : f32 to vector<1x32xf32>
    %cst_14 = arith.constant 0.000000e+00 : f32
    %18 = vector.broadcast %cst_14 : f32 to vector<1x32xf32>
    %19 = vector.extract_strided_slice %14 {offsets = [0, 0], sizes = [1, 128], strides = [1, 1]} : vector<8x128xf32> to vector<1x128xf32>
    %cst_15 = arith.constant dense<0.000000e+00> : vector<1x128xf32>
    %20 = tpu.matmul %15, %6, %cst_15 {dimension_numbers = #tpu.dot_dimension_numbers<[1], [0], [0], [1], [0, 0, 1, 1], [], []>} : vector<1x32xf32>, vector<32x128xf32>, vector<1x128xf32> -> vector<1x128xf32>
    %21 = arith.addf %19, %20 : vector<1x128xf32>
    %22 = arith.negf %21 : vector<1x128xf32>
    %23 = math.exp %22 : vector<1x128xf32>
    %cst_16 = arith.constant 1.000000e+00 : f32
    %24 = vector.broadcast %cst_16 : f32 to vector<1x128xf32>
    %25 = arith.addf %24, %23 : vector<1x128xf32>
    %26 = arith.divf %24, %25 : vector<1x128xf32>
    %27 = math.tanh %21 : vector<1x128xf32>
    %28 = arith.select %2, %26, %27 : vector<1x128xi1>, vector<1x128xf32>
    %29 = vector.extract_strided_slice %28 {offsets = [0, 0], sizes = [1, 32], strides = [1, 1]} : vector<1x128xf32> to vector<1x32xf32>
    %30 = vector.extract_strided_slice %28 {offsets = [0, 32], sizes = [1, 32], strides = [1, 1]} : vector<1x128xf32> to vector<1x32xf32>
    %31 = vector.extract_strided_slice %28 {offsets = [0, 64], sizes = [1, 32], strides = [1, 1]} : vector<1x128xf32> to vector<1x32xf32>
    %32 = vector.extract_strided_slice %28 {offsets = [0, 96], sizes = [1, 32], strides = [1, 1]} : vector<1x128xf32> to vector<1x32xf32>
    %33 = arith.mulf %30, %17 : vector<1x32xf32>
    %34 = arith.mulf %29, %32 : vector<1x32xf32>
    %35 = arith.addf %33, %34 : vector<1x32xf32>
    %36 = math.tanh %35 : vector<1x32xf32>
    %37 = arith.mulf %31, %36 : vector<1x32xf32>
    %38 = tpu.concatenate %37, %16 in 1 : vector<1x32xf32>, vector<1x32xf32> -> vector<1x64xf32>
    %cst_17 = arith.constant dense<0.000000e+00> : vector<1x128xf32>
    %39 = tpu.matmul %38, %7, %cst_17 {dimension_numbers = #tpu.dot_dimension_numbers<[1], [0], [0], [1], [0, 0, 1, 1], [], []>} : vector<1x64xf32>, vector<64x128xf32>, vector<1x128xf32> -> vector<1x128xf32>
    %40 = arith.addf %39, %8 : vector<1x128xf32>
    %41 = arith.negf %40 : vector<1x128xf32>
    %42 = math.exp %41 : vector<1x128xf32>
    %cst_18 = arith.constant 1.000000e+00 : f32
    %43 = vector.broadcast %cst_18 : f32 to vector<1x128xf32>
    %44 = arith.addf %43, %42 : vector<1x128xf32>
    %45 = arith.divf %43, %44 : vector<1x128xf32>
    %46 = math.tanh %40 : vector<1x128xf32>
    %47 = arith.select %2, %45, %46 : vector<1x128xi1>, vector<1x128xf32>
    %48 = vector.extract_strided_slice %47 {offsets = [0, 0], sizes = [1, 32], strides = [1, 1]} : vector<1x128xf32> to vector<1x32xf32>
    %49 = vector.extract_strided_slice %47 {offsets = [0, 32], sizes = [1, 32], strides = [1, 1]} : vector<1x128xf32> to vector<1x32xf32>
    %50 = vector.extract_strided_slice %47 {offsets = [0, 64], sizes = [1, 32], strides = [1, 1]} : vector<1x128xf32> to vector<1x32xf32>
    %51 = vector.extract_strided_slice %47 {offsets = [0, 96], sizes = [1, 32], strides = [1, 1]} : vector<1x128xf32> to vector<1x32xf32>
    %52 = arith.mulf %49, %18 : vector<1x32xf32>
    %53 = arith.mulf %48, %51 : vector<1x32xf32>
    %54 = arith.addf %52, %53 : vector<1x32xf32>
    %55 = math.tanh %54 : vector<1x32xf32>
    %56 = arith.mulf %50, %55 : vector<1x32xf32>
    %57 = vector.extract_strided_slice %14 {offsets = [1, 0], sizes = [1, 128], strides = [1, 1]} : vector<8x128xf32> to vector<1x128xf32>
    %cst_19 = arith.constant dense<0.000000e+00> : vector<1x128xf32>
    %58 = tpu.matmul %37, %6, %cst_19 {dimension_numbers = #tpu.dot_dimension_numbers<[1], [0], [0], [1], [0, 0, 1, 1], [], []>} : vector<1x32xf32>, vector<32x128xf32>, vector<1x128xf32> -> vector<1x128xf32>
    %59 = arith.addf %57, %58 : vector<1x128xf32>
    %60 = arith.negf %59 : vector<1x128xf32>
    %61 = math.exp %60 : vector<1x128xf32>
    %cst_20 = arith.constant 1.000000e+00 : f32
    %62 = vector.broadcast %cst_20 : f32 to vector<1x128xf32>
    %63 = arith.addf %62, %61 : vector<1x128xf32>
    %64 = arith.divf %62, %63 : vector<1x128xf32>
    %65 = math.tanh %59 : vector<1x128xf32>
    %66 = arith.select %2, %64, %65 : vector<1x128xi1>, vector<1x128xf32>
    %67 = vector.extract_strided_slice %66 {offsets = [0, 0], sizes = [1, 32], strides = [1, 1]} : vector<1x128xf32> to vector<1x32xf32>
    %68 = vector.extract_strided_slice %66 {offsets = [0, 32], sizes = [1, 32], strides = [1, 1]} : vector<1x128xf32> to vector<1x32xf32>
    %69 = vector.extract_strided_slice %66 {offsets = [0, 64], sizes = [1, 32], strides = [1, 1]} : vector<1x128xf32> to vector<1x32xf32>
    %70 = vector.extract_strided_slice %66 {offsets = [0, 96], sizes = [1, 32], strides = [1, 1]} : vector<1x128xf32> to vector<1x32xf32>
    %71 = arith.mulf %68, %35 : vector<1x32xf32>
    %72 = arith.mulf %67, %70 : vector<1x32xf32>
    %73 = arith.addf %71, %72 : vector<1x32xf32>
    %74 = math.tanh %73 : vector<1x32xf32>
    %75 = arith.mulf %69, %74 : vector<1x32xf32>
    %76 = tpu.concatenate %75, %56 in 1 : vector<1x32xf32>, vector<1x32xf32> -> vector<1x64xf32>
    %cst_21 = arith.constant dense<0.000000e+00> : vector<1x128xf32>
    %77 = tpu.matmul %76, %7, %cst_21 {dimension_numbers = #tpu.dot_dimension_numbers<[1], [0], [0], [1], [0, 0, 1, 1], [], []>} : vector<1x64xf32>, vector<64x128xf32>, vector<1x128xf32> -> vector<1x128xf32>
    %78 = arith.addf %77, %8 : vector<1x128xf32>
    %79 = arith.negf %78 : vector<1x128xf32>
    %80 = math.exp %79 : vector<1x128xf32>
    %cst_22 = arith.constant 1.000000e+00 : f32
    %81 = vector.broadcast %cst_22 : f32 to vector<1x128xf32>
    %82 = arith.addf %81, %80 : vector<1x128xf32>
    %83 = arith.divf %81, %82 : vector<1x128xf32>
    %84 = math.tanh %78 : vector<1x128xf32>
    %85 = arith.select %2, %83, %84 : vector<1x128xi1>, vector<1x128xf32>
    %86 = vector.extract_strided_slice %85 {offsets = [0, 0], sizes = [1, 32], strides = [1, 1]} : vector<1x128xf32> to vector<1x32xf32>
    %87 = vector.extract_strided_slice %85 {offsets = [0, 32], sizes = [1, 32], strides = [1, 1]} : vector<1x128xf32> to vector<1x32xf32>
    %88 = vector.extract_strided_slice %85 {offsets = [0, 64], sizes = [1, 32], strides = [1, 1]} : vector<1x128xf32> to vector<1x32xf32>
    %89 = vector.extract_strided_slice %85 {offsets = [0, 96], sizes = [1, 32], strides = [1, 1]} : vector<1x128xf32> to vector<1x32xf32>
    %90 = arith.mulf %87, %54 : vector<1x32xf32>
    %91 = arith.mulf %86, %89 : vector<1x32xf32>
    %92 = arith.addf %90, %91 : vector<1x32xf32>
    %93 = math.tanh %92 : vector<1x32xf32>
    %94 = arith.mulf %88, %93 : vector<1x32xf32>
    %95 = vector.extract_strided_slice %14 {offsets = [2, 0], sizes = [1, 128], strides = [1, 1]} : vector<8x128xf32> to vector<1x128xf32>
    %cst_23 = arith.constant dense<0.000000e+00> : vector<1x128xf32>
    %96 = tpu.matmul %75, %6, %cst_23 {dimension_numbers = #tpu.dot_dimension_numbers<[1], [0], [0], [1], [0, 0, 1, 1], [], []>} : vector<1x32xf32>, vector<32x128xf32>, vector<1x128xf32> -> vector<1x128xf32>
    %97 = arith.addf %95, %96 : vector<1x128xf32>
    %98 = arith.negf %97 : vector<1x128xf32>
    %99 = math.exp %98 : vector<1x128xf32>
    %cst_24 = arith.constant 1.000000e+00 : f32
    %100 = vector.broadcast %cst_24 : f32 to vector<1x128xf32>
    %101 = arith.addf %100, %99 : vector<1x128xf32>
    %102 = arith.divf %100, %101 : vector<1x128xf32>
    %103 = math.tanh %97 : vector<1x128xf32>
    %104 = arith.select %2, %102, %103 : vector<1x128xi1>, vector<1x128xf32>
    %105 = vector.extract_strided_slice %104 {offsets = [0, 0], sizes = [1, 32], strides = [1, 1]} : vector<1x128xf32> to vector<1x32xf32>
    %106 = vector.extract_strided_slice %104 {offsets = [0, 32], sizes = [1, 32], strides = [1, 1]} : vector<1x128xf32> to vector<1x32xf32>
    %107 = vector.extract_strided_slice %104 {offsets = [0, 64], sizes = [1, 32], strides = [1, 1]} : vector<1x128xf32> to vector<1x32xf32>
    %108 = vector.extract_strided_slice %104 {offsets = [0, 96], sizes = [1, 32], strides = [1, 1]} : vector<1x128xf32> to vector<1x32xf32>
    %109 = arith.mulf %106, %73 : vector<1x32xf32>
    %110 = arith.mulf %105, %108 : vector<1x32xf32>
    %111 = arith.addf %109, %110 : vector<1x32xf32>
    %112 = math.tanh %111 : vector<1x32xf32>
    %113 = arith.mulf %107, %112 : vector<1x32xf32>
    %114 = tpu.concatenate %113, %94 in 1 : vector<1x32xf32>, vector<1x32xf32> -> vector<1x64xf32>
    %cst_25 = arith.constant dense<0.000000e+00> : vector<1x128xf32>
    %115 = tpu.matmul %114, %7, %cst_25 {dimension_numbers = #tpu.dot_dimension_numbers<[1], [0], [0], [1], [0, 0, 1, 1], [], []>} : vector<1x64xf32>, vector<64x128xf32>, vector<1x128xf32> -> vector<1x128xf32>
    %116 = arith.addf %115, %8 : vector<1x128xf32>
    %117 = arith.negf %116 : vector<1x128xf32>
    %118 = math.exp %117 : vector<1x128xf32>
    %cst_26 = arith.constant 1.000000e+00 : f32
    %119 = vector.broadcast %cst_26 : f32 to vector<1x128xf32>
    %120 = arith.addf %119, %118 : vector<1x128xf32>
    %121 = arith.divf %119, %120 : vector<1x128xf32>
    %122 = math.tanh %116 : vector<1x128xf32>
    %123 = arith.select %2, %121, %122 : vector<1x128xi1>, vector<1x128xf32>
    %124 = vector.extract_strided_slice %123 {offsets = [0, 0], sizes = [1, 32], strides = [1, 1]} : vector<1x128xf32> to vector<1x32xf32>
    %125 = vector.extract_strided_slice %123 {offsets = [0, 32], sizes = [1, 32], strides = [1, 1]} : vector<1x128xf32> to vector<1x32xf32>
    %126 = vector.extract_strided_slice %123 {offsets = [0, 64], sizes = [1, 32], strides = [1, 1]} : vector<1x128xf32> to vector<1x32xf32>
    %127 = vector.extract_strided_slice %123 {offsets = [0, 96], sizes = [1, 32], strides = [1, 1]} : vector<1x128xf32> to vector<1x32xf32>
    %128 = arith.mulf %125, %92 : vector<1x32xf32>
    %129 = arith.mulf %124, %127 : vector<1x32xf32>
    %130 = arith.addf %128, %129 : vector<1x32xf32>
    %131 = math.tanh %130 : vector<1x32xf32>
    %132 = arith.mulf %126, %131 : vector<1x32xf32>
    %133 = vector.extract_strided_slice %14 {offsets = [3, 0], sizes = [1, 128], strides = [1, 1]} : vector<8x128xf32> to vector<1x128xf32>
    %cst_27 = arith.constant dense<0.000000e+00> : vector<1x128xf32>
    %134 = tpu.matmul %113, %6, %cst_27 {dimension_numbers = #tpu.dot_dimension_numbers<[1], [0], [0], [1], [0, 0, 1, 1], [], []>} : vector<1x32xf32>, vector<32x128xf32>, vector<1x128xf32> -> vector<1x128xf32>
    %135 = arith.addf %133, %134 : vector<1x128xf32>
    %136 = arith.negf %135 : vector<1x128xf32>
    %137 = math.exp %136 : vector<1x128xf32>
    %cst_28 = arith.constant 1.000000e+00 : f32
    %138 = vector.broadcast %cst_28 : f32 to vector<1x128xf32>
    %139 = arith.addf %138, %137 : vector<1x128xf32>
    %140 = arith.divf %138, %139 : vector<1x128xf32>
    %141 = math.tanh %135 : vector<1x128xf32>
    %142 = arith.select %2, %140, %141 : vector<1x128xi1>, vector<1x128xf32>
    %143 = vector.extract_strided_slice %142 {offsets = [0, 0], sizes = [1, 32], strides = [1, 1]} : vector<1x128xf32> to vector<1x32xf32>
    %144 = vector.extract_strided_slice %142 {offsets = [0, 32], sizes = [1, 32], strides = [1, 1]} : vector<1x128xf32> to vector<1x32xf32>
    %145 = vector.extract_strided_slice %142 {offsets = [0, 64], sizes = [1, 32], strides = [1, 1]} : vector<1x128xf32> to vector<1x32xf32>
    %146 = vector.extract_strided_slice %142 {offsets = [0, 96], sizes = [1, 32], strides = [1, 1]} : vector<1x128xf32> to vector<1x32xf32>
    %147 = arith.mulf %144, %111 : vector<1x32xf32>
    %148 = arith.mulf %143, %146 : vector<1x32xf32>
    %149 = arith.addf %147, %148 : vector<1x32xf32>
    %150 = math.tanh %149 : vector<1x32xf32>
    %151 = arith.mulf %145, %150 : vector<1x32xf32>
    %152 = tpu.concatenate %151, %132 in 1 : vector<1x32xf32>, vector<1x32xf32> -> vector<1x64xf32>
    %cst_29 = arith.constant dense<0.000000e+00> : vector<1x128xf32>
    %153 = tpu.matmul %152, %7, %cst_29 {dimension_numbers = #tpu.dot_dimension_numbers<[1], [0], [0], [1], [0, 0, 1, 1], [], []>} : vector<1x64xf32>, vector<64x128xf32>, vector<1x128xf32> -> vector<1x128xf32>
    %154 = arith.addf %153, %8 : vector<1x128xf32>
    %155 = arith.negf %154 : vector<1x128xf32>
    %156 = math.exp %155 : vector<1x128xf32>
    %cst_30 = arith.constant 1.000000e+00 : f32
    %157 = vector.broadcast %cst_30 : f32 to vector<1x128xf32>
    %158 = arith.addf %157, %156 : vector<1x128xf32>
    %159 = arith.divf %157, %158 : vector<1x128xf32>
    %160 = math.tanh %154 : vector<1x128xf32>
    %161 = arith.select %2, %159, %160 : vector<1x128xi1>, vector<1x128xf32>
    %162 = vector.extract_strided_slice %161 {offsets = [0, 0], sizes = [1, 32], strides = [1, 1]} : vector<1x128xf32> to vector<1x32xf32>
    %163 = vector.extract_strided_slice %161 {offsets = [0, 32], sizes = [1, 32], strides = [1, 1]} : vector<1x128xf32> to vector<1x32xf32>
    %164 = vector.extract_strided_slice %161 {offsets = [0, 64], sizes = [1, 32], strides = [1, 1]} : vector<1x128xf32> to vector<1x32xf32>
    %165 = vector.extract_strided_slice %161 {offsets = [0, 96], sizes = [1, 32], strides = [1, 1]} : vector<1x128xf32> to vector<1x32xf32>
    %166 = arith.mulf %163, %130 : vector<1x32xf32>
    %167 = arith.mulf %162, %165 : vector<1x32xf32>
    %168 = arith.addf %166, %167 : vector<1x32xf32>
    %169 = math.tanh %168 : vector<1x32xf32>
    %170 = arith.mulf %164, %169 : vector<1x32xf32>
    %171 = vector.extract_strided_slice %14 {offsets = [4, 0], sizes = [1, 128], strides = [1, 1]} : vector<8x128xf32> to vector<1x128xf32>
    %cst_31 = arith.constant dense<0.000000e+00> : vector<1x128xf32>
    %172 = tpu.matmul %151, %6, %cst_31 {dimension_numbers = #tpu.dot_dimension_numbers<[1], [0], [0], [1], [0, 0, 1, 1], [], []>} : vector<1x32xf32>, vector<32x128xf32>, vector<1x128xf32> -> vector<1x128xf32>
    %173 = arith.addf %171, %172 : vector<1x128xf32>
    %174 = arith.negf %173 : vector<1x128xf32>
    %175 = math.exp %174 : vector<1x128xf32>
    %cst_32 = arith.constant 1.000000e+00 : f32
    %176 = vector.broadcast %cst_32 : f32 to vector<1x128xf32>
    %177 = arith.addf %176, %175 : vector<1x128xf32>
    %178 = arith.divf %176, %177 : vector<1x128xf32>
    %179 = math.tanh %173 : vector<1x128xf32>
    %180 = arith.select %2, %178, %179 : vector<1x128xi1>, vector<1x128xf32>
    %181 = vector.extract_strided_slice %180 {offsets = [0, 0], sizes = [1, 32], strides = [1, 1]} : vector<1x128xf32> to vector<1x32xf32>
    %182 = vector.extract_strided_slice %180 {offsets = [0, 32], sizes = [1, 32], strides = [1, 1]} : vector<1x128xf32> to vector<1x32xf32>
    %183 = vector.extract_strided_slice %180 {offsets = [0, 64], sizes = [1, 32], strides = [1, 1]} : vector<1x128xf32> to vector<1x32xf32>
    %184 = vector.extract_strided_slice %180 {offsets = [0, 96], sizes = [1, 32], strides = [1, 1]} : vector<1x128xf32> to vector<1x32xf32>
    %185 = arith.mulf %182, %149 : vector<1x32xf32>
    %186 = arith.mulf %181, %184 : vector<1x32xf32>
    %187 = arith.addf %185, %186 : vector<1x32xf32>
    %188 = math.tanh %187 : vector<1x32xf32>
    %189 = arith.mulf %183, %188 : vector<1x32xf32>
    %190 = tpu.concatenate %189, %170 in 1 : vector<1x32xf32>, vector<1x32xf32> -> vector<1x64xf32>
    %cst_33 = arith.constant dense<0.000000e+00> : vector<1x128xf32>
    %191 = tpu.matmul %190, %7, %cst_33 {dimension_numbers = #tpu.dot_dimension_numbers<[1], [0], [0], [1], [0, 0, 1, 1], [], []>} : vector<1x64xf32>, vector<64x128xf32>, vector<1x128xf32> -> vector<1x128xf32>
    %192 = arith.addf %191, %8 : vector<1x128xf32>
    %193 = arith.negf %192 : vector<1x128xf32>
    %194 = math.exp %193 : vector<1x128xf32>
    %cst_34 = arith.constant 1.000000e+00 : f32
    %195 = vector.broadcast %cst_34 : f32 to vector<1x128xf32>
    %196 = arith.addf %195, %194 : vector<1x128xf32>
    %197 = arith.divf %195, %196 : vector<1x128xf32>
    %198 = math.tanh %192 : vector<1x128xf32>
    %199 = arith.select %2, %197, %198 : vector<1x128xi1>, vector<1x128xf32>
    %200 = vector.extract_strided_slice %199 {offsets = [0, 0], sizes = [1, 32], strides = [1, 1]} : vector<1x128xf32> to vector<1x32xf32>
    %201 = vector.extract_strided_slice %199 {offsets = [0, 32], sizes = [1, 32], strides = [1, 1]} : vector<1x128xf32> to vector<1x32xf32>
    %202 = vector.extract_strided_slice %199 {offsets = [0, 64], sizes = [1, 32], strides = [1, 1]} : vector<1x128xf32> to vector<1x32xf32>
    %203 = vector.extract_strided_slice %199 {offsets = [0, 96], sizes = [1, 32], strides = [1, 1]} : vector<1x128xf32> to vector<1x32xf32>
    %204 = arith.mulf %201, %168 : vector<1x32xf32>
    %205 = arith.mulf %200, %203 : vector<1x32xf32>
    %206 = arith.addf %204, %205 : vector<1x32xf32>
    %207 = math.tanh %206 : vector<1x32xf32>
    %208 = arith.mulf %202, %207 : vector<1x32xf32>
    %209 = vector.extract_strided_slice %14 {offsets = [5, 0], sizes = [1, 128], strides = [1, 1]} : vector<8x128xf32> to vector<1x128xf32>
    %cst_35 = arith.constant dense<0.000000e+00> : vector<1x128xf32>
    %210 = tpu.matmul %189, %6, %cst_35 {dimension_numbers = #tpu.dot_dimension_numbers<[1], [0], [0], [1], [0, 0, 1, 1], [], []>} : vector<1x32xf32>, vector<32x128xf32>, vector<1x128xf32> -> vector<1x128xf32>
    %211 = arith.addf %209, %210 : vector<1x128xf32>
    %212 = arith.negf %211 : vector<1x128xf32>
    %213 = math.exp %212 : vector<1x128xf32>
    %cst_36 = arith.constant 1.000000e+00 : f32
    %214 = vector.broadcast %cst_36 : f32 to vector<1x128xf32>
    %215 = arith.addf %214, %213 : vector<1x128xf32>
    %216 = arith.divf %214, %215 : vector<1x128xf32>
    %217 = math.tanh %211 : vector<1x128xf32>
    %218 = arith.select %2, %216, %217 : vector<1x128xi1>, vector<1x128xf32>
    %219 = vector.extract_strided_slice %218 {offsets = [0, 0], sizes = [1, 32], strides = [1, 1]} : vector<1x128xf32> to vector<1x32xf32>
    %220 = vector.extract_strided_slice %218 {offsets = [0, 32], sizes = [1, 32], strides = [1, 1]} : vector<1x128xf32> to vector<1x32xf32>
    %221 = vector.extract_strided_slice %218 {offsets = [0, 64], sizes = [1, 32], strides = [1, 1]} : vector<1x128xf32> to vector<1x32xf32>
    %222 = vector.extract_strided_slice %218 {offsets = [0, 96], sizes = [1, 32], strides = [1, 1]} : vector<1x128xf32> to vector<1x32xf32>
    %223 = arith.mulf %220, %187 : vector<1x32xf32>
    %224 = arith.mulf %219, %222 : vector<1x32xf32>
    %225 = arith.addf %223, %224 : vector<1x32xf32>
    %226 = math.tanh %225 : vector<1x32xf32>
    %227 = arith.mulf %221, %226 : vector<1x32xf32>
    %228 = tpu.concatenate %227, %208 in 1 : vector<1x32xf32>, vector<1x32xf32> -> vector<1x64xf32>
    %cst_37 = arith.constant dense<0.000000e+00> : vector<1x128xf32>
    %229 = tpu.matmul %228, %7, %cst_37 {dimension_numbers = #tpu.dot_dimension_numbers<[1], [0], [0], [1], [0, 0, 1, 1], [], []>} : vector<1x64xf32>, vector<64x128xf32>, vector<1x128xf32> -> vector<1x128xf32>
    %230 = arith.addf %229, %8 : vector<1x128xf32>
    %231 = arith.negf %230 : vector<1x128xf32>
    %232 = math.exp %231 : vector<1x128xf32>
    %cst_38 = arith.constant 1.000000e+00 : f32
    %233 = vector.broadcast %cst_38 : f32 to vector<1x128xf32>
    %234 = arith.addf %233, %232 : vector<1x128xf32>
    %235 = arith.divf %233, %234 : vector<1x128xf32>
    %236 = math.tanh %230 : vector<1x128xf32>
    %237 = arith.select %2, %235, %236 : vector<1x128xi1>, vector<1x128xf32>
    %238 = vector.extract_strided_slice %237 {offsets = [0, 0], sizes = [1, 32], strides = [1, 1]} : vector<1x128xf32> to vector<1x32xf32>
    %239 = vector.extract_strided_slice %237 {offsets = [0, 32], sizes = [1, 32], strides = [1, 1]} : vector<1x128xf32> to vector<1x32xf32>
    %240 = vector.extract_strided_slice %237 {offsets = [0, 64], sizes = [1, 32], strides = [1, 1]} : vector<1x128xf32> to vector<1x32xf32>
    %241 = vector.extract_strided_slice %237 {offsets = [0, 96], sizes = [1, 32], strides = [1, 1]} : vector<1x128xf32> to vector<1x32xf32>
    %242 = arith.mulf %239, %206 : vector<1x32xf32>
    %243 = arith.mulf %238, %241 : vector<1x32xf32>
    %244 = arith.addf %242, %243 : vector<1x32xf32>
    %245 = math.tanh %244 : vector<1x32xf32>
    %246 = arith.mulf %240, %245 : vector<1x32xf32>
    %247 = vector.extract_strided_slice %14 {offsets = [6, 0], sizes = [1, 128], strides = [1, 1]} : vector<8x128xf32> to vector<1x128xf32>
    %cst_39 = arith.constant dense<0.000000e+00> : vector<1x128xf32>
    %248 = tpu.matmul %227, %6, %cst_39 {dimension_numbers = #tpu.dot_dimension_numbers<[1], [0], [0], [1], [0, 0, 1, 1], [], []>} : vector<1x32xf32>, vector<32x128xf32>, vector<1x128xf32> -> vector<1x128xf32>
    %249 = arith.addf %247, %248 : vector<1x128xf32>
    %250 = arith.negf %249 : vector<1x128xf32>
    %251 = math.exp %250 : vector<1x128xf32>
    %cst_40 = arith.constant 1.000000e+00 : f32
    %252 = vector.broadcast %cst_40 : f32 to vector<1x128xf32>
    %253 = arith.addf %252, %251 : vector<1x128xf32>
    %254 = arith.divf %252, %253 : vector<1x128xf32>
    %255 = math.tanh %249 : vector<1x128xf32>
    %256 = arith.select %2, %254, %255 : vector<1x128xi1>, vector<1x128xf32>
    %257 = vector.extract_strided_slice %256 {offsets = [0, 0], sizes = [1, 32], strides = [1, 1]} : vector<1x128xf32> to vector<1x32xf32>
    %258 = vector.extract_strided_slice %256 {offsets = [0, 32], sizes = [1, 32], strides = [1, 1]} : vector<1x128xf32> to vector<1x32xf32>
    %259 = vector.extract_strided_slice %256 {offsets = [0, 64], sizes = [1, 32], strides = [1, 1]} : vector<1x128xf32> to vector<1x32xf32>
    %260 = vector.extract_strided_slice %256 {offsets = [0, 96], sizes = [1, 32], strides = [1, 1]} : vector<1x128xf32> to vector<1x32xf32>
    %261 = arith.mulf %258, %225 : vector<1x32xf32>
    %262 = arith.mulf %257, %260 : vector<1x32xf32>
    %263 = arith.addf %261, %262 : vector<1x32xf32>
    %264 = math.tanh %263 : vector<1x32xf32>
    %265 = arith.mulf %259, %264 : vector<1x32xf32>
    %266 = tpu.concatenate %265, %246 in 1 : vector<1x32xf32>, vector<1x32xf32> -> vector<1x64xf32>
    %cst_41 = arith.constant dense<0.000000e+00> : vector<1x128xf32>
    %267 = tpu.matmul %266, %7, %cst_41 {dimension_numbers = #tpu.dot_dimension_numbers<[1], [0], [0], [1], [0, 0, 1, 1], [], []>} : vector<1x64xf32>, vector<64x128xf32>, vector<1x128xf32> -> vector<1x128xf32>
    %268 = arith.addf %267, %8 : vector<1x128xf32>
    %269 = arith.negf %268 : vector<1x128xf32>
    %270 = math.exp %269 : vector<1x128xf32>
    %cst_42 = arith.constant 1.000000e+00 : f32
    %271 = vector.broadcast %cst_42 : f32 to vector<1x128xf32>
    %272 = arith.addf %271, %270 : vector<1x128xf32>
    %273 = arith.divf %271, %272 : vector<1x128xf32>
    %274 = math.tanh %268 : vector<1x128xf32>
    %275 = arith.select %2, %273, %274 : vector<1x128xi1>, vector<1x128xf32>
    %276 = vector.extract_strided_slice %275 {offsets = [0, 0], sizes = [1, 32], strides = [1, 1]} : vector<1x128xf32> to vector<1x32xf32>
    %277 = vector.extract_strided_slice %275 {offsets = [0, 32], sizes = [1, 32], strides = [1, 1]} : vector<1x128xf32> to vector<1x32xf32>
    %278 = vector.extract_strided_slice %275 {offsets = [0, 64], sizes = [1, 32], strides = [1, 1]} : vector<1x128xf32> to vector<1x32xf32>
    %279 = vector.extract_strided_slice %275 {offsets = [0, 96], sizes = [1, 32], strides = [1, 1]} : vector<1x128xf32> to vector<1x32xf32>
    %280 = arith.mulf %277, %244 : vector<1x32xf32>
    %281 = arith.mulf %276, %279 : vector<1x32xf32>
    %282 = arith.addf %280, %281 : vector<1x32xf32>
    %283 = math.tanh %282 : vector<1x32xf32>
    %284 = arith.mulf %278, %283 : vector<1x32xf32>
    %285 = vector.extract_strided_slice %14 {offsets = [7, 0], sizes = [1, 128], strides = [1, 1]} : vector<8x128xf32> to vector<1x128xf32>
    %cst_43 = arith.constant dense<0.000000e+00> : vector<1x128xf32>
    %286 = tpu.matmul %265, %6, %cst_43 {dimension_numbers = #tpu.dot_dimension_numbers<[1], [0], [0], [1], [0, 0, 1, 1], [], []>} : vector<1x32xf32>, vector<32x128xf32>, vector<1x128xf32> -> vector<1x128xf32>
    %287 = arith.addf %285, %286 : vector<1x128xf32>
    %288 = arith.negf %287 : vector<1x128xf32>
    %289 = math.exp %288 : vector<1x128xf32>
    %cst_44 = arith.constant 1.000000e+00 : f32
    %290 = vector.broadcast %cst_44 : f32 to vector<1x128xf32>
    %291 = arith.addf %290, %289 : vector<1x128xf32>
    %292 = arith.divf %290, %291 : vector<1x128xf32>
    %293 = math.tanh %287 : vector<1x128xf32>
    %294 = arith.select %2, %292, %293 : vector<1x128xi1>, vector<1x128xf32>
    %295 = vector.extract_strided_slice %294 {offsets = [0, 0], sizes = [1, 32], strides = [1, 1]} : vector<1x128xf32> to vector<1x32xf32>
    %296 = vector.extract_strided_slice %294 {offsets = [0, 32], sizes = [1, 32], strides = [1, 1]} : vector<1x128xf32> to vector<1x32xf32>
    %297 = vector.extract_strided_slice %294 {offsets = [0, 64], sizes = [1, 32], strides = [1, 1]} : vector<1x128xf32> to vector<1x32xf32>
    %298 = vector.extract_strided_slice %294 {offsets = [0, 96], sizes = [1, 32], strides = [1, 1]} : vector<1x128xf32> to vector<1x32xf32>
    %299 = arith.mulf %296, %263 : vector<1x32xf32>
    %300 = arith.mulf %295, %298 : vector<1x32xf32>
    %301 = arith.addf %299, %300 : vector<1x32xf32>
    %302 = math.tanh %301 : vector<1x32xf32>
    %303 = arith.mulf %297, %302 : vector<1x32xf32>
    %304 = tpu.concatenate %303, %284 in 1 : vector<1x32xf32>, vector<1x32xf32> -> vector<1x64xf32>
    %cst_45 = arith.constant dense<0.000000e+00> : vector<1x128xf32>
    %305 = tpu.matmul %304, %7, %cst_45 {dimension_numbers = #tpu.dot_dimension_numbers<[1], [0], [0], [1], [0, 0, 1, 1], [], []>} : vector<1x64xf32>, vector<64x128xf32>, vector<1x128xf32> -> vector<1x128xf32>
    %306 = arith.addf %305, %8 : vector<1x128xf32>
    %307 = arith.negf %306 : vector<1x128xf32>
    %308 = math.exp %307 : vector<1x128xf32>
    %cst_46 = arith.constant 1.000000e+00 : f32
    %309 = vector.broadcast %cst_46 : f32 to vector<1x128xf32>
    %310 = arith.addf %309, %308 : vector<1x128xf32>
    %311 = arith.divf %309, %310 : vector<1x128xf32>
    %312 = math.tanh %306 : vector<1x128xf32>
    %313 = arith.select %2, %311, %312 : vector<1x128xi1>, vector<1x128xf32>
    %314 = vector.extract_strided_slice %313 {offsets = [0, 0], sizes = [1, 32], strides = [1, 1]} : vector<1x128xf32> to vector<1x32xf32>
    %315 = vector.extract_strided_slice %313 {offsets = [0, 32], sizes = [1, 32], strides = [1, 1]} : vector<1x128xf32> to vector<1x32xf32>
    %316 = vector.extract_strided_slice %313 {offsets = [0, 64], sizes = [1, 32], strides = [1, 1]} : vector<1x128xf32> to vector<1x32xf32>
    %317 = vector.extract_strided_slice %313 {offsets = [0, 96], sizes = [1, 32], strides = [1, 1]} : vector<1x128xf32> to vector<1x32xf32>
    %318 = arith.mulf %315, %282 : vector<1x32xf32>
    %319 = arith.mulf %314, %317 : vector<1x32xf32>
    %320 = arith.addf %318, %319 : vector<1x32xf32>
    %321 = math.tanh %320 : vector<1x32xf32>
    %322 = arith.mulf %316, %321 : vector<1x32xf32>
    %c0_47 = arith.constant 0 : index
    %c0_48 = arith.constant 0 : index
    %323 = vector.load %arg6[%c0_47, %c0_48] : memref<36x16xf32, #tpu.memory_space<vmem>>, vector<36x16xf32>
    %c0_49 = arith.constant 0 : index
    %c0_50 = arith.constant 0 : index
    %324 = vector.load %arg7[%c0_49, %c0_50] : memref<1x16xf32, #tpu.memory_space<vmem>>, vector<1x16xf32>
    %c0_51 = arith.constant 0 : index
    %c0_52 = arith.constant 0 : index
    %325 = vector.load %arg8[%c0_51, %c0_52] : memref<8x16xf32, #tpu.memory_space<vmem>>, vector<8x16xf32>
    %c0_53 = arith.constant 0 : index
    %c0_54 = arith.constant 0 : index
    %326 = vector.load %arg9[%c0_53, %c0_54] : memref<1x16xf32, #tpu.memory_space<vmem>>, vector<1x16xf32>
    %327 = vector.extract_strided_slice %323 {offsets = [0, 0], sizes = [32, 16], strides = [1, 1]} : vector<36x16xf32> to vector<32x16xf32>
    %cst_55 = arith.constant dense<0.000000e+00> : vector<1x16xf32>
    %328 = tpu.matmul %303, %327, %cst_55 {dimension_numbers = #tpu.dot_dimension_numbers<[1], [0], [0], [1], [0, 0, 1, 1], [], []>} : vector<1x32xf32>, vector<32x16xf32>, vector<1x16xf32> -> vector<1x16xf32>
    %329 = arith.addf %328, %324 : vector<1x16xf32>
    %330 = arith.negf %329 : vector<1x16xf32>
    %331 = math.exp %330 : vector<1x16xf32>
    %cst_56 = arith.constant 1.000000e+00 : f32
    %332 = vector.broadcast %cst_56 : f32 to vector<1x16xf32>
    %333 = arith.addf %332, %331 : vector<1x16xf32>
    %334 = arith.divf %332, %333 : vector<1x16xf32>
    %335 = math.tanh %329 : vector<1x16xf32>
    %336 = arith.select %5, %334, %335 : vector<1x16xi1>, vector<1x16xf32>
    %337 = vector.extract_strided_slice %336 {offsets = [0, 0], sizes = [1, 4], strides = [1, 1]} : vector<1x16xf32> to vector<1x4xf32>
    %338 = vector.extract_strided_slice %336 {offsets = [0, 8], sizes = [1, 4], strides = [1, 1]} : vector<1x16xf32> to vector<1x4xf32>
    %339 = vector.extract_strided_slice %336 {offsets = [0, 12], sizes = [1, 4], strides = [1, 1]} : vector<1x16xf32> to vector<1x4xf32>
    %340 = arith.mulf %337, %339 : vector<1x4xf32>
    %341 = math.tanh %340 : vector<1x4xf32>
    %342 = arith.mulf %338, %341 : vector<1x4xf32>
    %343 = vector.extract_strided_slice %325 {offsets = [0, 0], sizes = [4, 16], strides = [1, 1]} : vector<8x16xf32> to vector<4x16xf32>
    %cst_57 = arith.constant dense<0.000000e+00> : vector<1x16xf32>
    %344 = tpu.matmul %342, %343, %cst_57 {dimension_numbers = #tpu.dot_dimension_numbers<[1], [0], [0], [1], [0, 0, 1, 1], [], []>} : vector<1x4xf32>, vector<4x16xf32>, vector<1x16xf32> -> vector<1x16xf32>
    %345 = arith.addf %344, %326 : vector<1x16xf32>
    %346 = arith.negf %345 : vector<1x16xf32>
    %347 = math.exp %346 : vector<1x16xf32>
    %cst_58 = arith.constant 1.000000e+00 : f32
    %348 = vector.broadcast %cst_58 : f32 to vector<1x16xf32>
    %349 = arith.addf %348, %347 : vector<1x16xf32>
    %350 = arith.divf %348, %349 : vector<1x16xf32>
    %351 = math.tanh %345 : vector<1x16xf32>
    %352 = arith.select %5, %350, %351 : vector<1x16xi1>, vector<1x16xf32>
    %353 = vector.extract_strided_slice %352 {offsets = [0, 0], sizes = [1, 4], strides = [1, 1]} : vector<1x16xf32> to vector<1x4xf32>
    %354 = vector.extract_strided_slice %352 {offsets = [0, 8], sizes = [1, 4], strides = [1, 1]} : vector<1x16xf32> to vector<1x4xf32>
    %355 = vector.extract_strided_slice %352 {offsets = [0, 12], sizes = [1, 4], strides = [1, 1]} : vector<1x16xf32> to vector<1x4xf32>
    %356 = arith.mulf %353, %355 : vector<1x4xf32>
    %357 = math.tanh %356 : vector<1x4xf32>
    %358 = arith.mulf %354, %357 : vector<1x4xf32>
    %c0_59 = arith.constant 0 : index
    %c0_60 = arith.constant 0 : index
    %359 = vector.load %arg10[%c0_59, %c0_60] : memref<2x4xf32, #tpu.memory_space<vmem>>, vector<1x4xf32>
    tpu.vector_store %arg10[%c0_59, %c0_60], %358 {strides = array<i32>} : memref<2x4xf32, #tpu.memory_space<vmem>>, vector<1x4xf32>,
    %360 = tpu.concatenate %322, %342 in 1 : vector<1x32xf32>, vector<1x4xf32> -> vector<1x36xf32>
    %cst_61 = arith.constant dense<0.000000e+00> : vector<1x16xf32>
    %361 = tpu.matmul %360, %323, %cst_61 {dimension_numbers = #tpu.dot_dimension_numbers<[1], [0], [0], [1], [0, 0, 1, 1], [], []>} : vector<1x36xf32>, vector<36x16xf32>, vector<1x16xf32> -> vector<1x16xf32>
    %362 = arith.addf %361, %324 : vector<1x16xf32>
    %363 = arith.negf %362 : vector<1x16xf32>
    %364 = math.exp %363 : vector<1x16xf32>
    %cst_62 = arith.constant 1.000000e+00 : f32
    %365 = vector.broadcast %cst_62 : f32 to vector<1x16xf32>
    %366 = arith.addf %365, %364 : vector<1x16xf32>
    %367 = arith.divf %365, %366 : vector<1x16xf32>
    %368 = math.tanh %362 : vector<1x16xf32>
    %369 = arith.select %5, %367, %368 : vector<1x16xi1>, vector<1x16xf32>
    %370 = vector.extract_strided_slice %369 {offsets = [0, 0], sizes = [1, 4], strides = [1, 1]} : vector<1x16xf32> to vector<1x4xf32>
    %371 = vector.extract_strided_slice %369 {offsets = [0, 4], sizes = [1, 4], strides = [1, 1]} : vector<1x16xf32> to vector<1x4xf32>
    %372 = vector.extract_strided_slice %369 {offsets = [0, 8], sizes = [1, 4], strides = [1, 1]} : vector<1x16xf32> to vector<1x4xf32>
    %373 = vector.extract_strided_slice %369 {offsets = [0, 12], sizes = [1, 4], strides = [1, 1]} : vector<1x16xf32> to vector<1x4xf32>
    %374 = arith.mulf %371, %340 : vector<1x4xf32>
    %375 = arith.mulf %370, %373 : vector<1x4xf32>
    %376 = arith.addf %374, %375 : vector<1x4xf32>
    %377 = math.tanh %376 : vector<1x4xf32>
    %378 = arith.mulf %372, %377 : vector<1x4xf32>
    %379 = tpu.concatenate %378, %358 in 1 : vector<1x4xf32>, vector<1x4xf32> -> vector<1x8xf32>
    %cst_63 = arith.constant dense<0.000000e+00> : vector<1x16xf32>
    %380 = tpu.matmul %379, %325, %cst_63 {dimension_numbers = #tpu.dot_dimension_numbers<[1], [0], [0], [1], [0, 0, 1, 1], [], []>} : vector<1x8xf32>, vector<8x16xf32>, vector<1x16xf32> -> vector<1x16xf32>
    %381 = arith.addf %380, %326 : vector<1x16xf32>
    %382 = arith.negf %381 : vector<1x16xf32>
    %383 = math.exp %382 : vector<1x16xf32>
    %cst_64 = arith.constant 1.000000e+00 : f32
    %384 = vector.broadcast %cst_64 : f32 to vector<1x16xf32>
    %385 = arith.addf %384, %383 : vector<1x16xf32>
    %386 = arith.divf %384, %385 : vector<1x16xf32>
    %387 = math.tanh %381 : vector<1x16xf32>
    %388 = arith.select %5, %386, %387 : vector<1x16xi1>, vector<1x16xf32>
    %389 = vector.extract_strided_slice %388 {offsets = [0, 0], sizes = [1, 4], strides = [1, 1]} : vector<1x16xf32> to vector<1x4xf32>
    %390 = vector.extract_strided_slice %388 {offsets = [0, 4], sizes = [1, 4], strides = [1, 1]} : vector<1x16xf32> to vector<1x4xf32>
    %391 = vector.extract_strided_slice %388 {offsets = [0, 8], sizes = [1, 4], strides = [1, 1]} : vector<1x16xf32> to vector<1x4xf32>
    %392 = vector.extract_strided_slice %388 {offsets = [0, 12], sizes = [1, 4], strides = [1, 1]} : vector<1x16xf32> to vector<1x4xf32>
    %393 = arith.mulf %390, %356 : vector<1x4xf32>
    %394 = arith.mulf %389, %392 : vector<1x4xf32>
    %395 = arith.addf %393, %394 : vector<1x4xf32>
    %396 = math.tanh %395 : vector<1x4xf32>
    %397 = arith.mulf %391, %396 : vector<1x4xf32>
    %c1 = arith.constant 1 : index
    %c0_65 = arith.constant 0 : index
    %398 = vector.load %arg10[%c1, %c0_65] : memref<2x4xf32, #tpu.memory_space<vmem>>, vector<1x4xf32>
    tpu.vector_store %arg10[%c1, %c0_65], %397 {strides = array<i32>} : memref<2x4xf32, #tpu.memory_space<vmem>>, vector<1x4xf32>,
    return
  }
}

</mosaic_0001>

<bundles_post_ra>
// kernel: tpu_custom_call.1
= control target key start
LH: loop header
LB: loop body
LE: loop exit
PB: predicated region body
PF: predicated region fallthrough
CT: control target
= control target key end

     0   :  { %15 = vsyncpa [#allocation3], 0  ;;  %s3770_s0 = inlined_call_operand.vmem [shape: f32[8,4], index: 0, kind: input, shape index: {}]   ;;  %s3771_s1 = inlined_call_operand.hbm [shape: f32[4,128], index: 1, kind: input, shape index: {}]   ;;  %s3772_s2 = inlined_call_operand.hbm [shape: f32[32,128], index: 2, kind: input, shape index: {}]   ;;  %s3773_s3 = inlined_call_operand.vmem [shape: f32[1,128], index: 3, kind: input, shape index: {}]   ;;  %s3774_s4 = inlined_call_operand.vmem [shape: f32[64,128], index: 4, kind: input, shape index: {}]   ;;  %s3775_s5 = inlined_call_operand.vmem [shape: f32[1,128], index: 5, kind: input, shape index: {}]   ;;  %s3776_s6 = inlined_call_operand.vmem [shape: f32[36,16], index: 6, kind: input, shape index: {}]   ;;  %s3777_s7 = inlined_call_operand.vmem [shape: f32[1,16], index: 7, kind: input, shape index: {}]   ;;  %s3778_s8 = inlined_call_operand.vmem [shape: f32[8,16], index: 8, kind: input, shape index: {}]   ;;  %s3779_s9 = inlined_call_operand.vmem [shape: f32[1,16], index: 9, kind: input, shape index: {}]   ;;  %s3780_s10 = inlined_call_operand.hbm [shape: f32[2,4], index: 10, kind: output, shape index: {}]  }
   0x1   :  { %16 = vsyncpa [#allocation6], 0 }
   0x2   :  { %17 = vsyncpa [#allocation4], 0  ;;  %s3187_s13 = smov [#allocation2]   ;;  %s3188_s15 = smov [#allocation5]  }
   0x3   :  { %s26_s14 = sshll.u32 %s3187_s13, 4  ;;  %s35_s16 = sshll.u32 %s3188_s15, 4  ;;  %s27_s14 = int_to_ptr.vmem [resolvable:$true] %s26_s14  ;;  %s3258_s16 = int_to_ptr.vmem [resolvable:$true] %s35_s16 }
   0x4   :  { %s3115_s19 = scalar_lea.hbm %s3771_s1, 64 }
   0x5   :  { %p3116_p0 = scmp.ne.s32.totalorder %s3771_s1, %s3115_s19  ;;  %p3119_p1 = scmp.lt.u32.totalorder %s3115_s19, %s3771_s1 }
   0x7   :  { %p3121_p2 = pnand %p3119_p1, %p3116_p0 }
   0x9   :  { %3124 = shalt.err (!%p3121_p2)
}
   0xa   :  { %s3125_s24 = scalar_lea.vmem %s27_s14, 64  ;;  %p3130_p4 = scmp.lt.s32.totalorder %s27_s14, %s27_s14 }
   0xb   :  { %p3126_p3 = scmp.ne.s32.totalorder %s27_s14, %s3125_s24  ;;  %p3131_p5 = scmp.lt.s32.totalorder %s3125_s24, %s3125_s24 }
   0xd   :  { %p3132_p6 = por %p3131_p5, %p3130_p4 }
   0xf   :  { %p3133_p7 = pnand %p3132_p6, %p3126_p3 }
  0x11   :  { %3136 = shalt.err (!%p3133_p7)
}
  0x12   :  { %29 = dma.hbm_to_vmem [thread:$0]  %s3771_s1, 64, %s27_s14, [#allocation3]  }
  0x13   :  { %s3137_s29 = scalar_lea.hbm %s3772_s2, 512 }
  0x14   :  { %p3138_p8 = scmp.ne.s32.totalorder %s3772_s2, %s3137_s29  ;;  %p3141_p9 = scmp.lt.u32.totalorder %s3137_s29, %s3772_s2 }
  0x16   :  { %p3143_p10 = pnand %p3141_p9, %p3138_p8 }
  0x18   :  { %3146 = shalt.err (!%p3143_p10)
}
  0x19   :  { %s3147_s15 = scalar_lea.vmem %s3258_s16, 512  ;;  %p3152_p12 = scmp.lt.s32.totalorder %s3258_s16, %s3258_s16 }
  0x1a   :  { %p3148_p11 = scmp.ne.s32.totalorder %s3258_s16, %s3147_s15  ;;  %p3153_p13 = scmp.lt.s32.totalorder %s3147_s15, %s3147_s15 }
  0x1c   :  { %p3154_p0 = por %p3153_p13, %p3152_p12 }
  0x1e   :  { %p3155_p1 = pnand %p3154_p0, %p3148_p11 }
  0x20   :  { %3158 = shalt.err (!%p3155_p1)
}
  0x21   :  { %s3189_s1 = smov 128   ;;  %s3190_s14 = smov 8  }
  0x22   :  { %41 = dma.hbm_to_vmem [thread:$0]  %s3772_s2, 512, %s3258_s16, [#allocation6], %s3189_s1, %s3189_s1, %s3190_s14  }
  0x23   :  { %3181 = dma.done.wait [#allocation3], 64  }
  0x24   :  { %3182 = vsyncadd [#allocation3], 4294967232 }
  0x25   :  { %3183 = dma.done.wait [#allocation6], 512  }
  0x26   :  { %3184 = vsyncadd [#allocation6], 4294966784  ;;  %v3191_v0 = vmov 0.0   ;;  %vm3192_vm0 = vmmov 0   ;;  %v3193_v1 = vmov 0.0|0.0   ;;  %vm92_vm1 = vcmask 1043456  }
  0x27   :  { %2503 = vmatprep.subr.mxu1 %v3191_v0  ;;  %2505 = vmatprep.mubr.msk.f32.mxu1 %vm3192_vm0, %v3191_v0  ;;  %vm88_vm2 = vcmask 31744   ;;  %v80_v2 = vld [vmem:[#allocation2] sm:$0xf]  ;;  %v79_v3 = vld [vmem:[%s3770_s0] sm:$0xff]  ;;  %v68_v6 = vld [vmem:[#allocation5 + $0x10] sm:$0xff]  ;;  %v62_v20 = vlaneseq  ;;  %s3195_s17 = smov 64  }
  0x28   :  { %2788 = vmatprep.subr.bf16.mxu0 %v3193_v1  ;;  %2535 = vmatprep.mubr.msk.f32.mxu0 %vm3192_vm0, %v3191_v0  ;;  %v66_v4 = vld [vmem:[#allocation5] sm:$0xff]  ;;  %v67_v5 = vld [vmem:[#allocation5 + $0x8] sm:$0xff]  ;;  %v69_v7 = vld [vmem:[#allocation5 + $0x18] sm:$0xff]  ;;  %vm166_vm4 = vcmask 261120   ;;  %vm271_vm5 = vcmask 523264   ;;  %s3196_s2 = smov 96  }
  0x29   :  { %2504 = vmatpush3.msk.msra.mxu1 %vm92_vm1, %v80_v2  ;;  %v3302_v8 = vpack.c.bf16 %v67_v5, %v66_v4  ;;  %v3307_v9 = vpack.c.bf16 %v69_v7, %v68_v6  ;;  %v2330_v12 = vld [vmem:[%s3773_s3] ss:$0 sm:$0xff]  ;;  %v3325_v21 = vand.u32 127, %v62_v20  ;;  %s3194_s3 = smov 32   ;;  %v71_v31 = vld [vmem:[%s3774_s4 + $0x8] sm:$0xff]  ;;  %v72_v32 = vld [vmem:[%s3774_s4 + $0x10] sm:$0xff] }
  0x2a   :  { %2506 = vmatmul.mubr.msk.f32.vlgmr.msra.gmra.mrb[0].mxu1 %vm88_vm2, %v79_v3  ;;  %2782 = vmatprep.subr.bf16.mxu1 %v3193_v1  ;;  %v70_v30 = vld [vmem:[%s3774_s4] sm:$0xff]  ;;  %v73_v34 = vld [vmem:[%s3774_s4 + $0x18] sm:$0xff]  ;;  %v75_v37 = vld [vmem:[%s3774_s4 + $0x28] sm:$0xff]  ;;  %s3198_s30 = smov 120   ;;  %s3199_s11 = smov 24   ;;  %vm2092_vm7 = vcmask 293888  }
  0x2b   :  { %2516 = vmatprep.mubr.msk.f32.mxu1 %vm3192_vm0, %v3191_v0  ;;  %2784 = vmatpush3.bf16.msra.mxu1 %v3302_v8  ;;  %vm64_vm3 = vcmp.lt.s32.totalorder %v3325_v21, 96  ;;  %v3344_v33 = vpack.c.bf16 %v71_v31, %v70_v30  ;;  %v3350_v35 = vpack.c.bf16 %v73_v34, %v72_v32  ;;  %v74_v36 = vld [vmem:[%s3774_s4 + $0x20] sm:$0xff]  ;;  %v76_v39 = vld [vmem:[%s3774_s4 + $0x30] sm:$0xff]  ;;  %v77_v40 = vld [vmem:[%s3774_s4 + $0x38] sm:$0xff]  ;;  %vm65_vm6 = vcmp.lt.s32.totalorder %v3325_v21, 12  ;;  %s3200_s12 = smov 4  }
  0x2c   :  { %2785 = vmatprep.subr.bf16.mxu1 %v3193_v1  ;;  %v3360_v38 = vpack.c.bf16 %v75_v37, %v74_v36  ;;  %v3371_v42 = vpack.c.bf16 %v77_v40, %v76_v39  ;;  %v3399_v47 = vld [vmem:[%s3775_s5] sm:$0x1]  ;;  %vm2206_vm8 = vcmask 64512   ;;  %vm2082_vm9 = vcmask 24576  }
  0x2d   :  { %2790 = vmatpush3.bf16.msra.mxu0 %v3344_v33 }
  0x2e   :  { %2791 = vmatprep.subr.bf16.mxu0 %v3193_v1 }
  0x2f   :  { %2787 = vmatpush3.bf16.msra.mxu1 %v3307_v9 }
  0x30   :  { %2800 = vmatprep.subr.bf16.mxu1 %v3193_v1 }
  0x31   :  { %2793 = vmatpush3.bf16.msra.mxu0 %v3350_v35 }
  0x32   :  { %2517 = vmatmul.mubr.f32.vlgmr.msra.gmra.mrb[2].mxu1 %v3191_v0  ;;  %2794 = vmatprep.subr.bf16.mxu0 %v3193_v1 }
  0x33   :  { %2802 = vmatpush3.bf16.msra.mxu1 %v3302_v8  ;;  %2546 = vmatprep.mubr.msk.f32.mxu1 %vm3192_vm0, %v3191_v0 }
  0x34   :  { %2803 = vmatprep.subr.bf16.mxu1 %v3193_v1 }
  0x35   :  { %2796 = vmatpush3.bf16.msra.mxu0 %v3360_v38 }
  0x36   :  { %2797 = vmatprep.subr.bf16.mxu0 %v3193_v1 }
  0x37   :  { %2805 = vmatpush3.bf16.msra.mxu1 %v3307_v9 }
  0x38   :  { %2806 = vmatprep.subr.bf16.mxu1 %v3193_v1 }
  0x39   :  { %2799 = vmatpush3.bf16.msra.mxu0 %v3371_v42 }
  0x3a   :  { %2818 = vmatprep.subr.bf16.mxu0 %v3193_v1 }
  0xfd   :  { %v162_v10 = vpop.f32.mrb[0].mxu1 }
  0xfe   :  { %v2507_v11 = vpop.f32.mrb[1].mxu1  ;;  %v3322_v13 = vadd.f32 %v2330_v12, %v162_v10 }
 0x105   :  { %v236_v14 = vpop.f32.mrb[2].mxu1 }
 0x106   :  { %v240_v15 = vadd.f32 %v236_v14, %v3322_v13  ;;  %v2518_v16 = vpop.f32.mrb[3].mxu1 }
 0x108   :  { %v2333_v17 = vmul.f32 -1.442695, %v240_v15 }
 0x10a   :  { %2954 = vpow2.f32 %v2333_v17 }
 0x10b   :  { %2956 = vtanh.f32 %v240_v15 }
 0x114   :  { %v2955_v18 = vpop.eup %2954 }
 0x115   :  { %v244_v19 = vadd.f32 1.0, %v2955_v18  ;;  %v2957_v22 = vpop.eup %2956 }
 0x117   :  { %2958 = vrcp.f32 %v244_v19 }
 0x121   :  { %v2959_v23 = vpop.eup %2958 }
 0x122   :  { %v248_v24 = vsel %vm64_vm3, %v2959_v23, %v2957_v22 }
 0x123   :  { %251 = vrot.lane.b32.xlu0 %v248_v24, %s3194_s3  ;;  %v249_v27 = vmul.f32 0.0, %v248_v24 }
 0x195   :  { %v252_v25 = vpop.permute.xlu0 %251 }
 0x196   :  { %v254_v26 = vmul.f32 %v252_v25, %v248_v24 }
 0x198   :  { %256 = vrot.lane.b32.xlu0 %v254_v26, %s3194_s3 }
 0x20a   :  { %v257_v28 = vpop.permute.xlu0 %256 }
 0x20b   :  { %v3332_v29 = vadd.f32 %v257_v28, %v249_v27 }
 0x20d   :  { %2960 = vtanh.f32 %v3332_v29  ;;  %v455_v11 = vrot.slane %v3332_v29, 7 }
 0x217   :  { %v2961_v41 = vpop.eup %2960 }
 0x218   :  { %262 = vrot.lane.b32.xlu1 %v2961_v41, %s3194_s3 }
 0x28a   :  { %v263_v43 = vpop.permute.xlu1 %262 }
 0x28b   :  { %v265_v44 = vmul.f32 %v263_v43, %v248_v24 }
 0x28d   :  { %267 = vrot.lane.b32.xlu1 %v265_v44, %s3195_s17 }
 0x2ff   :  { %v268_v45 = vpop.permute.xlu1 %267 }
 0x300   :  { %v270_v46 = vsel %vm166_vm4, %v268_v45, 0.0  ;;  %2547 = vmatmul.mubr.msk.f32.vlgmr.msra.gmra.mrb[4].mxu1 %vm166_vm4, %v268_v45 }
 0x301   :  { %2536 = vmatmul.mubr.msk.f32.vlgmr.msra.gmra.mrb[0].mxu0 %vm271_vm5, %v270_v46  ;;  %2808 = vmatpush3.bf16.msra.mxu1 %v3344_v33 }
 0x302   :  { %2809 = vmatprep.subr.bf16.mxu1 %v3193_v1  ;;  %2820 = vmatpush3.bf16.msra.mxu0 %v3302_v8 }
 0x303   :  { %2821 = vmatprep.subr.bf16.mxu0 %v3193_v1  ;;  %2565 = vmatprep.mubr.msk.f32.mxu1 %vm3192_vm0, %v3191_v0 }
 0x304   :  { %2576 = vmatprep.mubr.msk.f32.mxu0 %vm3192_vm0, %v3191_v0 }
 0x305   :  { %2811 = vmatpush3.bf16.msra.mxu1 %v3350_v35 }
 0x306   :  { %2812 = vmatprep.subr.bf16.mxu1 %v3193_v1  ;;  %2823 = vmatpush3.bf16.msra.mxu0 %v3307_v9 }
 0x307   :  { %2824 = vmatprep.subr.bf16.mxu0 %v3193_v1 }
 0x309   :  { %2814 = vmatpush3.bf16.msra.mxu1 %v3360_v38 }
 0x30a   :  { %2815 = vmatprep.subr.bf16.mxu1 %v3193_v1 }
 0x30d   :  { %2817 = vmatpush3.bf16.msra.mxu1 %v3371_v42 }
 0x30e   :  { %2836 = vmatprep.subr.bf16.mxu1 %v3193_v1 }
 0x3d3   :  { %v438_v48 = vpop.f32.mrb[4].mxu1 }
 0x3d4   :  { %v443_v49 = vrot.slane %v438_v48, 7  ;;  %v341_v50 = vpop.f32.mrb[0].mxu0  ;;  %v2548_v51 = vpop.f32.mrb[5].mxu1 }
 0x3d5   :  { %v342_v52 = vadd.f32 %v341_v50, %v3399_v47  ;;  %v2537_v53 = vpop.f32.mrb[1].mxu0 }
 0x3d6   :  { %v445_v54 = vadd.f32 %v443_v49, %v3322_v13 }
 0x3d7   :  { %v2335_v55 = vmul.f32 -1.442695, %v342_v52 }
 0x3d8   :  { %v2337_v56 = vmul.f32 -1.442695, %v445_v54 }
 0x3d9   :  { %2962 = vpow2.f32 %v2335_v55 }
 0x3da   :  { %2964 = vpow2.f32 %v2337_v56 }
 0x3db   :  { %2966 = vtanh.f32 %v342_v52 }
 0x3dc   :  { %2968 = vtanh.f32 %v445_v54 }
 0x3e3   :  { %v2963_v57 = vpop.eup %2962 }
 0x3e4   :  { %v2965_v58 = vpop.eup %2964  ;;  %v348_v59 = vadd.f32 1.0, %v2963_v57 }
 0x3e5   :  { %v449_v60 = vadd.f32 1.0, %v2965_v58  ;;  %v2967_v61 = vpop.eup %2966 }
 0x3e6   :  { %2970 = vrcp.f32 %v348_v59  ;;  %v2969_v62 = vpop.eup %2968 }
 0x3e7   :  { %2972 = vrcp.f32 %v449_v60 }
 0x3f0   :  { %v2971_v63 = vpop.eup %2970 }
 0x3f1   :  { %v2973_v2 = vpop.eup %2972  ;;  %v352_v3 = vsel %vm64_vm3, %v2971_v63, %v2967_v61 }
 0x3f2   :  { %355 = vrot.lane.b32.xlu0 %v352_v3, %s3194_s3  ;;  %v453_v4 = vsel %vm64_vm3, %v2973_v2, %v2969_v62  ;;  %v353_v12 = vmul.f32 0.0, %v352_v3 }
 0x3f3   :  { %459 = vrot.lane.b32.xlu1 %v453_v4, %s3194_s3  ;;  %v457_v15 = vmul.f32 %v455_v11, %v453_v4 }
 0x464   :  { %v356_v5 = vpop.permute.xlu0 %355 }
 0x465   :  { %v358_v6 = vmul.f32 %v356_v5, %v352_v3  ;;  %v460_v7 = vpop.permute.xlu1 %459 }
 0x466   :  { %v462_v10 = vmul.f32 %v460_v7, %v453_v4 }
 0x467   :  { %360 = vrot.lane.b32.xlu0 %v358_v6, %s3194_s3 }
 0x468   :  { %464 = vrot.lane.b32.xlu1 %v462_v10, %s3194_s3 }
 0x4d9   :  { %v361_v14 = vpop.permute.xlu0 %360 }
 0x4da   :  { %v3412_v16 = vadd.f32 %v361_v14, %v353_v12  ;;  %v465_v17 = vpop.permute.xlu1 %464 }
 0x4db   :  { %v3414_v18 = vadd.f32 %v465_v17, %v457_v15 }
 0x4dc   :  { %2974 = vtanh.f32 %v3412_v16 }
 0x4dd   :  { %2976 = vtanh.f32 %v3414_v18  ;;  %v671_v61 = vrot.slane %v3414_v18, 7 }
 0x4e6   :  { %v2975_v19 = vpop.eup %2974 }
 0x4e7   :  { %v2977_v20 = vpop.eup %2976  ;;  %366 = vrot.lane.b32.xlu0 %v2975_v19, %s3194_s3 }
 0x4e8   :  { %470 = vrot.lane.b32.xlu1 %v2977_v20, %s3194_s3 }
 0x559   :  { %v367_v22 = vpop.permute.xlu0 %366 }
 0x55a   :  { %v369_v23 = vmul.f32 %v367_v22, %v352_v3  ;;  %v471_v24 = vpop.permute.xlu1 %470 }
 0x55b   :  { %v473_v25 = vmul.f32 %v471_v24, %v453_v4 }
 0x55c   :  { %v479_v26 = vrot.slane %v369_v23, 7 }
 0x55d   :  { %475 = vrot.lane.b32.xlu0 %v473_v25, %s3195_s17  ;;  %v583_v27 = vrot.slane %v473_v25, 1 }
 0x55e   :  { %480 = vrot.lane.b32.xlu1 %v479_v26, %s3196_s2 }
 0x561   :  { %584 = vrot.lane.b32.xlu0 %v583_v27, %s3195_s17 }
 0x5cf   :  { %v476_v28 = vpop.permute.xlu0 %475 }
 0x5d0   :  { %v481_v29 = vpop.permute.xlu1 %480 }
 0x5d1   :  { %v483_v30 = vsel %vm166_vm4, %v476_v28, %v481_v29 }
 0x5d2   :  { %v485_v31 = vrot.slane %v483_v30, 1 }
 0x5d3   :  { %v585_v32 = vpop.permute.xlu0 %584 }
 0x5d4   :  { %2566 = vmatmul.mubr.msk.f32.vlgmr.msra.gmra.mrb[6].mxu1 %vm271_vm5, %v485_v31  ;;  %2577 = vmatmul.mubr.msk.f32.vlgmr.msra.gmra.mrb[2].mxu0 %vm166_vm4, %v585_v32 }
 0x5d5   :  { %2826 = vmatpush3.bf16.msra.mxu0 %v3344_v33  ;;  %2838 = vmatpush3.bf16.msra.mxu1 %v3302_v8 }
 0x5d6   :  { %2827 = vmatprep.subr.bf16.mxu0 %v3193_v1  ;;  %2839 = vmatprep.subr.bf16.mxu1 %v3193_v1 }
 0x5d7   :  { %2595 = vmatprep.mubr.msk.f32.mxu0 %vm3192_vm0, %v3191_v0  ;;  %2606 = vmatprep.mubr.msk.f32.mxu1 %vm3192_vm0, %v3191_v0 }
 0x5d9   :  { %2829 = vmatpush3.bf16.msra.mxu0 %v3350_v35  ;;  %2841 = vmatpush3.bf16.msra.mxu1 %v3307_v9 }
 0x5da   :  { %2830 = vmatprep.subr.bf16.mxu0 %v3193_v1  ;;  %2842 = vmatprep.subr.bf16.mxu1 %v3193_v1 }
 0x5dd   :  { %2832 = vmatpush3.bf16.msra.mxu0 %v3360_v38 }
 0x5de   :  { %2833 = vmatprep.subr.bf16.mxu0 %v3193_v1 }
 0x5e1   :  { %2835 = vmatpush3.bf16.msra.mxu0 %v3371_v42 }
 0x5e2   :  { %2854 = vmatprep.subr.bf16.mxu0 %v3193_v1 }
 0x6a7   :  { %v554_v34 = vpop.f32.mrb[6].mxu1  ;;  %v654_v36 = vpop.f32.mrb[2].mxu0 }
 0x6a8   :  { %v555_v37 = vadd.f32 %v554_v34, %v3399_v47  ;;  %v659_v39 = vrot.slane %v654_v36, 6  ;;  %v2567_v40 = vpop.f32.mrb[7].mxu1  ;;  %v2578_v41 = vpop.f32.mrb[3].mxu0 }
 0x6aa   :  { %v2339_v43 = vmul.f32 -1.442695, %v555_v37  ;;  %v661_v44 = vadd.f32 %v659_v39, %v3322_v13 }
 0x6ac   :  { %2978 = vpow2.f32 %v2339_v43  ;;  %v2341_v45 = vmul.f32 -1.442695, %v661_v44 }
 0x6ae   :  { %2980 = vpow2.f32 %v2341_v45 }
 0x6af   :  { %2982 = vtanh.f32 %v555_v37 }
 0x6b6   :  { %v2979_v46 = vpop.eup %2978 }
 0x6b7   :  { %v561_v48 = vadd.f32 1.0, %v2979_v46 }
 0x6b8   :  { %v2981_v49 = vpop.eup %2980 }
 0x6b9   :  { %2984 = vrcp.f32 %v561_v48  ;;  %v665_v50 = vadd.f32 1.0, %v2981_v49  ;;  %v2983_v51 = vpop.eup %2982 }
 0x6ba   :  { %2986 = vtanh.f32 %v661_v44 }
 0x6bb   :  { %2988 = vrcp.f32 %v665_v50 }
 0x6c3   :  { %v2985_v52 = vpop.eup %2984 }
 0x6c4   :  { %v2987_v53 = vpop.eup %2986  ;;  %v565_v54 = vsel %vm64_vm3, %v2985_v52, %v2983_v51 }
 0x6c5   :  { %v2989_v55 = vpop.eup %2988  ;;  %568 = vrot.lane.b32.xlu1 %v565_v54, %s3194_s3  ;;  %v566_v62 = vmul.f32 %v565_v54, %v3412_v16 }
 0x6c6   :  { %v669_v56 = vsel %vm64_vm3, %v2989_v55, %v2987_v53 }
 0x6c7   :  { %675 = vrot.lane.b32.xlu0 %v669_v56, %s3194_s3  ;;  %v673_v3 = vmul.f32 %v671_v61, %v669_v56 }
 0x737   :  { %v569_v57 = vpop.permute.xlu1 %568 }
 0x738   :  { %v571_v58 = vmul.f32 %v569_v57, %v565_v54 }
 0x739   :  { %v676_v59 = vpop.permute.xlu0 %675 }
 0x73a   :  { %v678_v60 = vmul.f32 %v676_v59, %v669_v56  ;;  %573 = vrot.lane.b32.xlu1 %v571_v58, %s3194_s3 }
 0x73c   :  { %680 = vrot.lane.b32.xlu0 %v678_v60, %s3194_s3 }
 0x7ac   :  { %v574_v63 = vpop.permute.xlu1 %573 }
 0x7ad   :  { %v3454_v2 = vadd.f32 %v574_v63, %v566_v62 }
 0x7ae   :  { %v681_v4 = vpop.permute.xlu0 %680 }
 0x7af   :  { %2990 = vtanh.f32 %v3454_v2  ;;  %v3457_v5 = vadd.f32 %v681_v4, %v673_v3 }
 0x7b1   :  { %2992 = vtanh.f32 %v3457_v5  ;;  %v887_v52 = vrot.slane %v3457_v5, 7 }
 0x7b9   :  { %v2991_v6 = vpop.eup %2990 }
 0x7ba   :  { %579 = vrot.lane.b32.xlu1 %v2991_v6, %s3194_s3 }
 0x7bb   :  { %v2993_v7 = vpop.eup %2992 }
 0x7bc   :  { %686 = vrot.lane.b32.xlu0 %v2993_v7, %s3194_s3 }
 0x82c   :  { %v580_v10 = vpop.permute.xlu1 %579 }
 0x82d   :  { %v582_v11 = vmul.f32 %v580_v10, %v565_v54 }
 0x82e   :  { %v687_v12 = vpop.permute.xlu0 %686 }
 0x82f   :  { %v695_v14 = vrot.slane %v582_v11, 6  ;;  %v689_v15 = vmul.f32 %v687_v12, %v669_v56 }
 0x831   :  { %691 = vrot.lane.b32.xlu1 %v689_v15, %s3195_s17  ;;  %696 = vrot.lane.b32.xlu0 %v695_v14, %s3196_s2  ;;  %v799_v16 = vrot.slane %v689_v15, 2 }
 0x835   :  { %800 = vrot.lane.b32.xlu1 %v799_v16, %s3195_s17 }
 0x8a3   :  { %v697_v17 = vpop.permute.xlu0 %696  ;;  %v692_v18 = vpop.permute.xlu1 %691 }
 0x8a4   :  { %v699_v19 = vsel %vm166_vm4, %v692_v18, %v697_v17 }
 0x8a5   :  { %v701_v20 = vrot.slane %v699_v19, 2 }
 0x8a7   :  { %2596 = vmatmul.mubr.msk.f32.vlgmr.msra.gmra.mrb[4].mxu0 %vm271_vm5, %v701_v20  ;;  %v801_v22 = vpop.permute.xlu1 %800 }
 0x8a8   :  { %2607 = vmatmul.mubr.msk.f32.vlgmr.msra.gmra.mrb[8].mxu1 %vm166_vm4, %v801_v22  ;;  %2856 = vmatpush3.bf16.msra.mxu0 %v3302_v8 }
 0x8a9   :  { %2844 = vmatpush3.bf16.msra.mxu1 %v3344_v33  ;;  %2857 = vmatprep.subr.bf16.mxu0 %v3193_v1 }
 0x8aa   :  { %2845 = vmatprep.subr.bf16.mxu1 %v3193_v1  ;;  %2625 = vmatprep.mubr.msk.f32.mxu1 %vm3192_vm0, %v3191_v0 }
 0x8ab   :  { %2636 = vmatprep.mubr.msk.f32.mxu0 %vm3192_vm0, %v3191_v0 }
 0x8ac   :  { %2859 = vmatpush3.bf16.msra.mxu0 %v3307_v9 }
 0x8ad   :  { %2847 = vmatpush3.bf16.msra.mxu1 %v3350_v35  ;;  %2860 = vmatprep.subr.bf16.mxu0 %v3193_v1 }
 0x8ae   :  { %2848 = vmatprep.subr.bf16.mxu1 %v3193_v1 }
 0x8b1   :  { %2850 = vmatpush3.bf16.msra.mxu1 %v3360_v38 }
 0x8b2   :  { %2851 = vmatprep.subr.bf16.mxu1 %v3193_v1 }
 0x8b5   :  { %2853 = vmatpush3.bf16.msra.mxu1 %v3371_v42 }
 0x8b6   :  { %2872 = vmatprep.subr.bf16.mxu1 %v3193_v1 }
 0x97a   :  { %v770_v23 = vpop.f32.mrb[4].mxu0 }
 0x97b   :  { %v771_v24 = vadd.f32 %v770_v23, %v3399_v47  ;;  %v2597_v25 = vpop.f32.mrb[5].mxu0  ;;  %v870_v26 = vpop.f32.mrb[8].mxu1 }
 0x97c   :  { %v875_v27 = vrot.slane %v870_v26, 5  ;;  %v2608_v28 = vpop.f32.mrb[9].mxu1 }
 0x97d   :  { %v2343_v29 = vmul.f32 -1.442695, %v771_v24 }
 0x97e   :  { %v877_v30 = vadd.f32 %v875_v27, %v3322_v13 }
 0x97f   :  { %2994 = vpow2.f32 %v2343_v29 }
 0x980   :  { %v2345_v31 = vmul.f32 -1.442695, %v877_v30 }
 0x982   :  { %2996 = vpow2.f32 %v2345_v31 }
 0x983   :  { %2998 = vtanh.f32 %v771_v24 }
 0x989   :  { %v2995_v32 = vpop.eup %2994 }
 0x98a   :  { %v777_v34 = vadd.f32 1.0, %v2995_v32 }
 0x98c   :  { %v2997_v36 = vpop.eup %2996  ;;  %3000 = vrcp.f32 %v777_v34 }
 0x98d   :  { %v881_v37 = vadd.f32 1.0, %v2997_v36  ;;  %3002 = vtanh.f32 %v877_v30  ;;  %v2999_v39 = vpop.eup %2998 }
 0x98f   :  { %3004 = vrcp.f32 %v881_v37 }
 0x996   :  { %v3001_v40 = vpop.eup %3000 }
 0x997   :  { %v781_v41 = vsel %vm64_vm3, %v3001_v40, %v2999_v39  ;;  %v3003_v43 = vpop.eup %3002 }
 0x998   :  { %784 = vrot.lane.b32.xlu0 %v781_v41, %s3194_s3  ;;  %v782_v51 = vmul.f32 %v781_v41, %v3454_v2 }
 0x999   :  { %v3005_v44 = vpop.eup %3004 }
 0x99a   :  { %v885_v45 = vsel %vm64_vm3, %v3005_v44, %v3003_v43 }
 0x99b   :  { %891 = vrot.lane.b32.xlu1 %v885_v45, %s3194_s3  ;;  %v889_v55 = vmul.f32 %v887_v52, %v885_v45 }
 0xa0a   :  { %v785_v46 = vpop.permute.xlu0 %784 }
 0xa0b   :  { %v787_v48 = vmul.f32 %v785_v46, %v781_v41 }
 0xa0d   :  { %789 = vrot.lane.b32.xlu0 %v787_v48, %s3194_s3  ;;  %v892_v49 = vpop.permute.xlu1 %891 }
 0xa0e   :  { %v894_v50 = vmul.f32 %v892_v49, %v885_v45 }
 0xa10   :  { %896 = vrot.lane.b32.xlu1 %v894_v50, %s3194_s3 }
 0xa7f   :  { %v790_v53 = vpop.permute.xlu0 %789 }
 0xa80   :  { %v3496_v54 = vadd.f32 %v790_v53, %v782_v51 }
 0xa82   :  { %3006 = vtanh.f32 %v3496_v54  ;;  %v897_v56 = vpop.permute.xlu1 %896 }
 0xa83   :  { %v3499_v57 = vadd.f32 %v897_v56, %v889_v55 }
 0xa85   :  { %3008 = vtanh.f32 %v3499_v57  ;;  %v1103_v40 = vrot.slane %v3499_v57, 7 }
 0xa8c   :  { %v3007_v58 = vpop.eup %3006 }
 0xa8d   :  { %795 = vrot.lane.b32.xlu0 %v3007_v58, %s3194_s3 }
 0xa8f   :  { %v3009_v59 = vpop.eup %3008 }
 0xa90   :  { %902 = vrot.lane.b32.xlu1 %v3009_v59, %s3194_s3 }
 0xaff   :  { %v796_v60 = vpop.permute.xlu0 %795 }
 0xb00   :  { %v798_v61 = vmul.f32 %v796_v60, %v781_v41 }
 0xb02   :  { %v911_v62 = vrot.slane %v798_v61, 5  ;;  %v903_v63 = vpop.permute.xlu1 %902 }
 0xb03   :  { %v905_v2 = vmul.f32 %v903_v63, %v885_v45 }
 0xb04   :  { %912 = vrot.lane.b32.xlu1 %v911_v62, %s3196_s2 }
 0xb05   :  { %907 = vrot.lane.b32.xlu0 %v905_v2, %s3195_s17  ;;  %v1015_v3 = vrot.slane %v905_v2, 3 }
 0xb09   :  { %1016 = vrot.lane.b32.xlu0 %v1015_v3, %s3195_s17 }
 0xb76   :  { %v913_v4 = vpop.permute.xlu1 %912 }
 0xb77   :  { %v908_v5 = vpop.permute.xlu0 %907 }
 0xb78   :  { %v915_v6 = vsel %vm166_vm4, %v908_v5, %v913_v4 }
 0xb79   :  { %v917_v7 = vrot.slane %v915_v6, 3 }
 0xb7b   :  { %v1017_v10 = vpop.permute.xlu0 %1016  ;;  %2626 = vmatmul.mubr.msk.f32.vlgmr.msra.gmra.mrb[10].mxu1 %vm271_vm5, %v917_v7 }
 0xb7c   :  { %2637 = vmatmul.mubr.msk.f32.vlgmr.msra.gmra.mrb[6].mxu0 %vm166_vm4, %v1017_v10  ;;  %2874 = vmatpush3.bf16.msra.mxu1 %v3302_v8 }
 0xb7d   :  { %2862 = vmatpush3.bf16.msra.mxu0 %v3344_v33  ;;  %2875 = vmatprep.subr.bf16.mxu1 %v3193_v1 }
 0xb7e   :  { %2863 = vmatprep.subr.bf16.mxu0 %v3193_v1  ;;  %2655 = vmatprep.mubr.msk.f32.mxu0 %vm3192_vm0, %v3191_v0 }
 0xb7f   :  { %2666 = vmatprep.mubr.msk.f32.mxu1 %vm3192_vm0, %v3191_v0 }
 0xb80   :  { %2877 = vmatpush3.bf16.msra.mxu1 %v3307_v9 }
 0xb81   :  { %2865 = vmatpush3.bf16.msra.mxu0 %v3350_v35  ;;  %2878 = vmatprep.subr.bf16.mxu1 %v3193_v1 }
 0xb82   :  { %2866 = vmatprep.subr.bf16.mxu0 %v3193_v1 }
 0xb85   :  { %2868 = vmatpush3.bf16.msra.mxu0 %v3360_v38 }
 0xb86   :  { %2869 = vmatprep.subr.bf16.mxu0 %v3193_v1 }
 0xb89   :  { %2871 = vmatpush3.bf16.msra.mxu0 %v3371_v42 }
 0xb8a   :  { %2890 = vmatprep.subr.bf16.mxu0 %v3193_v1 }
 0xc4e   :  { %v986_v11 = vpop.f32.mrb[10].mxu1 }
 0xc4f   :  { %v987_v12 = vadd.f32 %v986_v11, %v3399_v47  ;;  %v2627_v14 = vpop.f32.mrb[11].mxu1  ;;  %v1086_v15 = vpop.f32.mrb[6].mxu0 }
 0xc50   :  { %v1091_v16 = vrot.slane %v1086_v15, 4  ;;  %v2638_v17 = vpop.f32.mrb[7].mxu0 }
 0xc51   :  { %v2347_v18 = vmul.f32 -1.442695, %v987_v12 }
 0xc52   :  { %v1093_v19 = vadd.f32 %v1091_v16, %v3322_v13 }
 0xc53   :  { %3010 = vpow2.f32 %v2347_v18 }
 0xc54   :  { %v2349_v20 = vmul.f32 -1.442695, %v1093_v19 }
 0xc56   :  { %3012 = vpow2.f32 %v2349_v20 }
 0xc57   :  { %3014 = vtanh.f32 %v987_v12 }
 0xc5d   :  { %v3011_v22 = vpop.eup %3010 }
 0xc5e   :  { %v993_v23 = vadd.f32 1.0, %v3011_v22 }
 0xc60   :  { %v3013_v24 = vpop.eup %3012  ;;  %3016 = vrcp.f32 %v993_v23 }
 0xc61   :  { %v1097_v25 = vadd.f32 1.0, %v3013_v24  ;;  %3018 = vtanh.f32 %v1093_v19  ;;  %v3015_v26 = vpop.eup %3014 }
 0xc63   :  { %3020 = vrcp.f32 %v1097_v25 }
 0xc6a   :  { %v3017_v27 = vpop.eup %3016 }
 0xc6b   :  { %v997_v28 = vsel %vm64_vm3, %v3017_v27, %v3015_v26  ;;  %v3019_v29 = vpop.eup %3018 }
 0xc6c   :  { %1000 = vrot.lane.b32.xlu1 %v997_v28, %s3194_s3  ;;  %v998_v39 = vmul.f32 %v997_v28, %v3496_v54 }
 0xc6d   :  { %v3021_v30 = vpop.eup %3020 }
 0xc6e   :  { %v1101_v31 = vsel %vm64_vm3, %v3021_v30, %v3019_v29 }
 0xc6f   :  { %1107 = vrot.lane.b32.xlu0 %v1101_v31, %s3194_s3  ;;  %v1105_v44 = vmul.f32 %v1103_v40, %v1101_v31 }
 0xcde   :  { %v1001_v32 = vpop.permute.xlu1 %1000 }
 0xcdf   :  { %v1003_v34 = vmul.f32 %v1001_v32, %v997_v28 }
 0xce1   :  { %v1108_v36 = vpop.permute.xlu0 %1107  ;;  %1005 = vrot.lane.b32.xlu1 %v1003_v34, %s3194_s3 }
 0xce2   :  { %v1110_v37 = vmul.f32 %v1108_v36, %v1101_v31 }
 0xce4   :  { %1112 = vrot.lane.b32.xlu0 %v1110_v37, %s3194_s3 }
 0xd53   :  { %v1006_v41 = vpop.permute.xlu1 %1005 }
 0xd54   :  { %v3538_v43 = vadd.f32 %v1006_v41, %v998_v39 }
 0xd56   :  { %3022 = vtanh.f32 %v3538_v43  ;;  %v1113_v45 = vpop.permute.xlu0 %1112 }
 0xd57   :  { %v3541_v46 = vadd.f32 %v1113_v45, %v1105_v44 }
 0xd59   :  { %3024 = vtanh.f32 %v3541_v46  ;;  %v1319_v27 = vrot.slane %v3541_v46, 7 }
 0xd60   :  { %v3023_v48 = vpop.eup %3022 }
 0xd61   :  { %1011 = vrot.lane.b32.xlu1 %v3023_v48, %s3194_s3 }
 0xd63   :  { %v3025_v49 = vpop.eup %3024 }
 0xd64   :  { %1118 = vrot.lane.b32.xlu0 %v3025_v49, %s3194_s3 }
 0xdd3   :  { %v1012_v50 = vpop.permute.xlu1 %1011 }
 0xdd4   :  { %v1014_v51 = vmul.f32 %v1012_v50, %v997_v28 }
 0xdd6   :  { %v1127_v52 = vrot.slane %v1014_v51, 4  ;;  %v1119_v53 = vpop.permute.xlu0 %1118 }
 0xdd7   :  { %v1121_v54 = vmul.f32 %v1119_v53, %v1101_v31 }
 0xdd8   :  { %1128 = vrot.lane.b32.xlu0 %v1127_v52, %s3196_s2 }
 0xdd9   :  { %1123 = vrot.lane.b32.xlu1 %v1121_v54, %s3195_s17  ;;  %v1231_v55 = vrot.slane %v1121_v54, 4 }
 0xddd   :  { %1232 = vrot.lane.b32.xlu1 %v1231_v55, %s3195_s17 }
 0xe4a   :  { %v1129_v56 = vpop.permute.xlu0 %1128 }
 0xe4b   :  { %v1124_v57 = vpop.permute.xlu1 %1123 }
 0xe4c   :  { %v1131_v58 = vsel %vm166_vm4, %v1124_v57, %v1129_v56 }
 0xe4d   :  { %v1133_v59 = vrot.slane %v1131_v58, 4 }
 0xe4f   :  { %2656 = vmatmul.mubr.msk.f32.vlgmr.msra.gmra.mrb[8].mxu0 %vm271_vm5, %v1133_v59  ;;  %v1233_v60 = vpop.permute.xlu1 %1232 }
 0xe50   :  { %2667 = vmatmul.mubr.msk.f32.vlgmr.msra.gmra.mrb[12].mxu1 %vm166_vm4, %v1233_v60  ;;  %2892 = vmatpush3.bf16.msra.mxu0 %v3302_v8 }
 0xe51   :  { %2880 = vmatpush3.bf16.msra.mxu1 %v3344_v33  ;;  %2893 = vmatprep.subr.bf16.mxu0 %v3193_v1 }
 0xe52   :  { %2881 = vmatprep.subr.bf16.mxu1 %v3193_v1  ;;  %2685 = vmatprep.mubr.msk.f32.mxu1 %vm3192_vm0, %v3191_v0 }
 0xe53   :  { %2696 = vmatprep.mubr.msk.f32.mxu0 %vm3192_vm0, %v3191_v0 }
 0xe54   :  { %2895 = vmatpush3.bf16.msra.mxu0 %v3307_v9 }
 0xe55   :  { %2883 = vmatpush3.bf16.msra.mxu1 %v3350_v35  ;;  %2896 = vmatprep.subr.bf16.mxu0 %v3193_v1 }
 0xe56   :  { %2884 = vmatprep.subr.bf16.mxu1 %v3193_v1 }
 0xe59   :  { %2886 = vmatpush3.bf16.msra.mxu1 %v3360_v38 }
 0xe5a   :  { %2887 = vmatprep.subr.bf16.mxu1 %v3193_v1 }
 0xe5d   :  { %2889 = vmatpush3.bf16.msra.mxu1 %v3371_v42 }
 0xe5e   :  { %2908 = vmatprep.subr.bf16.mxu1 %v3193_v1 }
 0xf22   :  { %v1202_v61 = vpop.f32.mrb[8].mxu0 }
 0xf23   :  { %v1203_v62 = vadd.f32 %v1202_v61, %v3399_v47  ;;  %v2657_v63 = vpop.f32.mrb[9].mxu0  ;;  %v1302_v2 = vpop.f32.mrb[12].mxu1 }
 0xf24   :  { %v1307_v3 = vrot.slane %v1302_v2, 3  ;;  %v2668_v4 = vpop.f32.mrb[13].mxu1 }
 0xf25   :  { %v2351_v5 = vmul.f32 -1.442695, %v1203_v62 }
 0xf26   :  { %v1309_v6 = vadd.f32 %v1307_v3, %v3322_v13 }
 0xf27   :  { %3026 = vpow2.f32 %v2351_v5 }
 0xf28   :  { %v2353_v7 = vmul.f32 -1.442695, %v1309_v6 }
 0xf2a   :  { %3028 = vpow2.f32 %v2353_v7 }
 0xf2b   :  { %3030 = vtanh.f32 %v1203_v62 }
 0xf31   :  { %v3027_v10 = vpop.eup %3026 }
 0xf32   :  { %v1209_v11 = vadd.f32 1.0, %v3027_v10 }
 0xf34   :  { %v3029_v12 = vpop.eup %3028  ;;  %3032 = vrcp.f32 %v1209_v11 }
 0xf35   :  { %v1313_v14 = vadd.f32 1.0, %v3029_v12  ;;  %3034 = vtanh.f32 %v1309_v6  ;;  %v3031_v15 = vpop.eup %3030 }
 0xf37   :  { %3036 = vrcp.f32 %v1313_v14 }
 0xf3e   :  { %v3033_v16 = vpop.eup %3032 }
 0xf3f   :  { %v1213_v17 = vsel %vm64_vm3, %v3033_v16, %v3031_v15  ;;  %v3035_v18 = vpop.eup %3034 }
 0xf40   :  { %1216 = vrot.lane.b32.xlu0 %v1213_v17, %s3194_s3  ;;  %v1214_v26 = vmul.f32 %v1213_v17, %v3538_v43 }
 0xf41   :  { %v3037_v19 = vpop.eup %3036 }
 0xf42   :  { %v1317_v20 = vsel %vm64_vm3, %v3037_v19, %v3035_v18 }
 0xf43   :  { %1323 = vrot.lane.b32.xlu1 %v1317_v20, %s3194_s3  ;;  %v1321_v30 = vmul.f32 %v1319_v27, %v1317_v20 }
 0xfb2   :  { %v1217_v22 = vpop.permute.xlu0 %1216 }
 0xfb3   :  { %v1219_v23 = vmul.f32 %v1217_v22, %v1213_v17 }
 0xfb5   :  { %1221 = vrot.lane.b32.xlu0 %v1219_v23, %s3194_s3  ;;  %v1324_v24 = vpop.permute.xlu1 %1323 }
 0xfb6   :  { %v1326_v25 = vmul.f32 %v1324_v24, %v1317_v20 }
 0xfb8   :  { %1328 = vrot.lane.b32.xlu1 %v1326_v25, %s3194_s3 }
0x1027   :  { %v1222_v28 = vpop.permute.xlu0 %1221 }
0x1028   :  { %v3580_v29 = vadd.f32 %v1222_v28, %v1214_v26 }
0x102a   :  { %3038 = vtanh.f32 %v3580_v29  ;;  %v1329_v31 = vpop.permute.xlu1 %1328 }
0x102b   :  { %v3583_v32 = vadd.f32 %v1329_v31, %v1321_v30 }
0x102d   :  { %3040 = vtanh.f32 %v3583_v32  ;;  %v1535_v14 = vrot.slane %v3583_v32, 7 }
0x1034   :  { %v3039_v34 = vpop.eup %3038 }
0x1035   :  { %1227 = vrot.lane.b32.xlu0 %v3039_v34, %s3194_s3 }
0x1037   :  { %v3041_v36 = vpop.eup %3040 }
0x1038   :  { %1334 = vrot.lane.b32.xlu1 %v3041_v36, %s3194_s3 }
0x10a7   :  { %v1228_v37 = vpop.permute.xlu0 %1227 }
0x10a8   :  { %v1230_v39 = vmul.f32 %v1228_v37, %v1213_v17 }
0x10aa   :  { %v1343_v40 = vrot.slane %v1230_v39, 3  ;;  %v1335_v41 = vpop.permute.xlu1 %1334 }
0x10ab   :  { %v1337_v43 = vmul.f32 %v1335_v41, %v1317_v20 }
0x10ac   :  { %1344 = vrot.lane.b32.xlu1 %v1343_v40, %s3196_s2 }
0x10ad   :  { %1339 = vrot.lane.b32.xlu0 %v1337_v43, %s3195_s17  ;;  %v1447_v44 = vrot.slane %v1337_v43, 5 }
0x10b1   :  { %1448 = vrot.lane.b32.xlu0 %v1447_v44, %s3195_s17 }
0x111e   :  { %v1345_v45 = vpop.permute.xlu1 %1344 }
0x111f   :  { %v1340_v46 = vpop.permute.xlu0 %1339 }
0x1120   :  { %v1347_v48 = vsel %vm166_vm4, %v1340_v46, %v1345_v45 }
0x1121   :  { %v1349_v49 = vrot.slane %v1347_v48, 5 }
0x1123   :  { %v1449_v50 = vpop.permute.xlu0 %1448  ;;  %2686 = vmatmul.mubr.msk.f32.vlgmr.msra.gmra.mrb[14].mxu1 %vm271_vm5, %v1349_v49 }
0x1124   :  { %2697 = vmatmul.mubr.msk.f32.vlgmr.msra.gmra.mrb[10].mxu0 %vm166_vm4, %v1449_v50  ;;  %2910 = vmatpush3.bf16.msra.mxu1 %v3302_v8 }
0x1125   :  { %2898 = vmatpush3.bf16.msra.mxu0 %v3344_v33  ;;  %2911 = vmatprep.subr.bf16.mxu1 %v3193_v1 }
0x1126   :  { %2899 = vmatprep.subr.bf16.mxu0 %v3193_v1  ;;  %2715 = vmatprep.mubr.msk.f32.mxu0 %vm3192_vm0, %v3191_v0 }
0x1127   :  { %2726 = vmatprep.mubr.msk.f32.mxu1 %vm3192_vm0, %v3191_v0 }
0x1128   :  { %2913 = vmatpush3.bf16.msra.mxu1 %v3307_v9 }
0x1129   :  { %2901 = vmatpush3.bf16.msra.mxu0 %v3350_v35  ;;  %2914 = vmatprep.subr.bf16.mxu1 %v3193_v1 }
0x112a   :  { %2902 = vmatprep.subr.bf16.mxu0 %v3193_v1 }
0x112d   :  { %2904 = vmatpush3.bf16.msra.mxu0 %v3360_v38 }
0x112e   :  { %2905 = vmatprep.subr.bf16.mxu0 %v3193_v1 }
0x1131   :  { %2907 = vmatpush3.bf16.msra.mxu0 %v3371_v42 }
0x1132   :  { %2926 = vmatprep.subr.bf16.mxu0 %v3193_v1 }
0x11f6   :  { %v1418_v8 = vpop.f32.mrb[14].mxu1 }
0x11f7   :  { %v1419_v51 = vadd.f32 %v1418_v8, %v3399_v47  ;;  %v2687_v52 = vpop.f32.mrb[15].mxu1  ;;  %v1518_v53 = vpop.f32.mrb[10].mxu0 }
0x11f8   :  { %v1523_v9 = vrot.slane %v1518_v53, 2  ;;  %v2698_v54 = vpop.f32.mrb[11].mxu0 }
0x11f9   :  { %v2355_v55 = vmul.f32 -1.442695, %v1419_v51 }
0x11fa   :  { %v1525_v56 = vadd.f32 %v1523_v9, %v3322_v13 }
0x11fb   :  { %3042 = vpow2.f32 %v2355_v55 }
0x11fc   :  { %v2357_v57 = vmul.f32 -1.442695, %v1525_v56 }
0x11fe   :  { %3044 = vpow2.f32 %v2357_v57 }
0x11ff   :  { %3046 = vtanh.f32 %v1419_v51 }
0x1205   :  { %v3043_v58 = vpop.eup %3042 }
0x1206   :  { %v1425_v59 = vadd.f32 1.0, %v3043_v58 }
0x1208   :  { %v3045_v60 = vpop.eup %3044  ;;  %3048 = vrcp.f32 %v1425_v59 }
0x1209   :  { %v1529_v61 = vadd.f32 1.0, %v3045_v60  ;;  %3050 = vtanh.f32 %v1525_v56  ;;  %v3047_v62 = vpop.eup %3046 }
0x120b   :  { %3052 = vrcp.f32 %v1529_v61  ;;  %v1879_v61 = vld [vmem:[%s3776_s6] sm:$0xff] }
0x1212   :  { %v3049_v63 = vpop.eup %3048 }
0x1213   :  { %v1429_v2 = vsel %vm64_vm3, %v3049_v63, %v3047_v62  ;;  %v3051_v3 = vpop.eup %3050  ;;  %v1880_v62 = vld [vmem:[%s3776_s6 + $0x8] sm:$0xff] }
0x1214   :  { %1432 = vrot.lane.b32.xlu1 %v1429_v2, %s3194_s3  ;;  %v1430_v12 = vmul.f32 %v1429_v2, %v3580_v29  ;;  %v3669_v63 = vpack.c.bf16 %v1880_v62, %v1879_v61 }
0x1215   :  { %v3053_v4 = vpop.eup %3052 }
0x1216   :  { %v1533_v5 = vsel %vm64_vm3, %v3053_v4, %v3051_v3  ;;  %v1881_v4 = vld [vmem:[%s3776_s6 + $0x10] sm:$0xff] }
0x1217   :  { %1539 = vrot.lane.b32.xlu0 %v1533_v5, %s3194_s3  ;;  %v1537_v17 = vmul.f32 %v1535_v14, %v1533_v5 }
0x1286   :  { %v1433_v6 = vpop.permute.xlu1 %1432 }
0x1287   :  { %v1435_v7 = vmul.f32 %v1433_v6, %v1429_v2 }
0x1289   :  { %v1540_v10 = vpop.permute.xlu0 %1539  ;;  %1437 = vrot.lane.b32.xlu1 %v1435_v7, %s3194_s3 }
0x128a   :  { %v1542_v11 = vmul.f32 %v1540_v10, %v1533_v5 }
0x128c   :  { %1544 = vrot.lane.b32.xlu0 %v1542_v11, %s3194_s3 }
0x12fb   :  { %v1438_v15 = vpop.permute.xlu1 %1437 }
0x12fc   :  { %v3622_v16 = vadd.f32 %v1438_v15, %v1430_v12 }
0x12fe   :  { %3054 = vtanh.f32 %v3622_v16  ;;  %v1545_v18 = vpop.permute.xlu0 %1544 }
0x12ff   :  { %v3625_v19 = vadd.f32 %v1545_v18, %v1537_v17 }
0x1301   :  { %3056 = vtanh.f32 %v3625_v19  ;;  %v1751_v55 = vrot.slane %v3625_v19, 7 }
0x1308   :  { %v3055_v20 = vpop.eup %3054 }
0x1309   :  { %1443 = vrot.lane.b32.xlu1 %v3055_v20, %s3194_s3 }
0x130b   :  { %v3057_v22 = vpop.eup %3056 }
0x130c   :  { %1550 = vrot.lane.b32.xlu0 %v3057_v22, %s3194_s3  ;;  %v3698_v22 = vld [vmem:[%s3777_s7] sm:$0x1] }
0x137b   :  { %v1444_v23 = vpop.permute.xlu1 %1443 }
0x137c   :  { %v1446_v24 = vmul.f32 %v1444_v23, %v1429_v2 }
0x137e   :  { %v1559_v25 = vrot.slane %v1446_v24, 2  ;;  %v1551_v26 = vpop.permute.xlu0 %1550  ;;  %v3114_v24 = vld [vmem:[%s3775_s5] sm:$0x1]  ;;  %s3197_s5 = smov 116  }
0x137f   :  { %v1553_v27 = vmul.f32 %v1551_v26, %v1533_v5  ;;  %v1882_v5 = vld [vmem:[%s3776_s6 + $0x18] sm:$0xff] }
0x1380   :  { %1560 = vrot.lane.b32.xlu0 %v1559_v25, %s3196_s2  ;;  %v3681_v6 = vpack.c.bf16 %v1882_v5, %v1881_v4 }
0x1381   :  { %1555 = vrot.lane.b32.xlu1 %v1553_v27, %s3195_s17  ;;  %v1663_v28 = vrot.slane %v1553_v27, 6 }
0x1385   :  { %1664 = vrot.lane.b32.xlu1 %v1663_v28, %s3195_s17 }
0x13f2   :  { %v1561_v29 = vpop.permute.xlu0 %1560 }
0x13f3   :  { %v1556_v30 = vpop.permute.xlu1 %1555 }
0x13f4   :  { %v1563_v31 = vsel %vm166_vm4, %v1556_v30, %v1561_v29 }
0x13f5   :  { %v1565_v32 = vrot.slane %v1563_v31, 6 }
0x13f7   :  { %2716 = vmatmul.mubr.msk.f32.vlgmr.msra.gmra.mrb[12].mxu0 %vm271_vm5, %v1565_v32  ;;  %v1665_v34 = vpop.permute.xlu1 %1664 }
0x13f8   :  { %2727 = vmatmul.mubr.msk.f32.vlgmr.msra.gmra.mrb[16].mxu1 %vm166_vm4, %v1665_v34  ;;  %2756 = vmatprep.mubr.msk.f32.mxu0 %vm3192_vm0, %v3191_v0 }
0x13f9   :  { %2916 = vmatpush3.bf16.msra.mxu1 %v3344_v33  ;;  %2745 = vmatprep.mubr.msk.f32.mxu1 %vm3192_vm0, %v3191_v0 }
0x13fa   :  { %2917 = vmatprep.subr.bf16.mxu1 %v3193_v1  ;;  %2928 = vmatpush3.bf16.msra.mxu0 %v3669_v63 }
0x13fb   :  { %2929 = vmatprep.subr.bf16.mxu0 %v3193_v1 }
0x13fd   :  { %2919 = vmatpush3.bf16.msra.mxu1 %v3350_v35 }
0x13fe   :  { %2920 = vmatprep.subr.bf16.mxu1 %v3193_v1  ;;  %2931 = vmatpush3.bf16.msra.mxu0 %v3681_v6 }
0x13ff   :  { %2759 = vmatprep.subr.mxu0 %v3191_v0 }
0x1401   :  { %2922 = vmatpush3.bf16.msra.mxu1 %v3360_v38 }
0x1402   :  { %2923 = vmatprep.subr.bf16.mxu1 %v3193_v1 }
0x1405   :  { %2925 = vmatpush3.bf16.msra.mxu1 %v3371_v42 }
0x1406   :  { %2777 = vmatprep.subr.mxu1 %v3191_v0 }
0x14ca   :  { %v1634_v36 = vpop.f32.mrb[12].mxu0 }
0x14cb   :  { %v1635_v33 = vadd.f32 %v1634_v36, %v3399_v47  ;;  %v2717_v37 = vpop.f32.mrb[13].mxu0  ;;  %v1734_v39 = vpop.f32.mrb[16].mxu1 }
0x14cc   :  { %v1739_v40 = vrot.slane %v1734_v39, 1  ;;  %v2728_v41 = vpop.f32.mrb[17].mxu1 }
0x14cd   :  { %v2359_v43 = vmul.f32 -1.442695, %v1635_v33 }
0x14ce   :  { %v1741_v35 = vadd.f32 %v1739_v40, %v3322_v13 }
0x14cf   :  { %3058 = vpow2.f32 %v2359_v43 }
0x14d0   :  { %v2361_v44 = vmul.f32 -1.442695, %v1741_v35 }
0x14d2   :  { %3060 = vpow2.f32 %v2361_v44 }
0x14d3   :  { %3062 = vtanh.f32 %v1635_v33 }
0x14d9   :  { %v3059_v38 = vpop.eup %3058 }
0x14da   :  { %v1641_v45 = vadd.f32 1.0, %v3059_v38 }
0x14dc   :  { %v3061_v46 = vpop.eup %3060  ;;  %3064 = vrcp.f32 %v1641_v45 }
0x14dd   :  { %v1745_v42 = vadd.f32 1.0, %v3061_v46  ;;  %3066 = vtanh.f32 %v1741_v35  ;;  %v3063_v48 = vpop.eup %3062 }
0x14df   :  { %3068 = vrcp.f32 %v1745_v42 }
0x14e6   :  { %v3065_v47 = vpop.eup %3064 }
0x14e7   :  { %v1645_v49 = vsel %vm64_vm3, %v3065_v47, %v3063_v48  ;;  %v3067_v50 = vpop.eup %3066 }
0x14e8   :  { %1648 = vrot.lane.b32.xlu0 %v1645_v49, %s3194_s3  ;;  %v1646_v54 = vmul.f32 %v1645_v49, %v3622_v16 }
0x14e9   :  { %v3069_v13 = vpop.eup %3068 }
0x14ea   :  { %v1749_v8 = vsel %vm64_vm3, %v3069_v13, %v3067_v50  ;;  %v1885_v50 = vld [vmem:[%s3778_s8] sm:$0xff] }
0x14eb   :  { %1755 = vrot.lane.b32.xlu1 %v1749_v8, %s3194_s3  ;;  %v1753_v58 = vmul.f32 %v1751_v55, %v1749_v8 }
0x155a   :  { %v1649_v51 = vpop.permute.xlu0 %1648 }
0x155b   :  { %v1651_v52 = vmul.f32 %v1649_v51, %v1645_v49 }
0x155d   :  { %1653 = vrot.lane.b32.xlu0 %v1651_v52, %s3194_s3  ;;  %v1756_v53 = vpop.permute.xlu1 %1755 }
0x155e   :  { %v1758_v9 = vmul.f32 %v1756_v53, %v1749_v8 }
0x1560   :  { %1760 = vrot.lane.b32.xlu1 %v1758_v9, %s3194_s3 }
0x15cf   :  { %v1654_v56 = vpop.permute.xlu0 %1653 }
0x15d0   :  { %v3660_v57 = vadd.f32 %v1654_v56, %v1646_v54  ;;  %v1883_v54 = vld [vmem:[%s3776_s6 + $0x20] sm:$0xf]  ;;  %s3201_s6 = smov 124  }
0x15d2   :  { %3070 = vtanh.f32 %v3660_v57  ;;  %v1761_v59 = vpop.permute.xlu1 %1760 }
0x15d3   :  { %v1763_v60 = vadd.f32 %v1761_v59, %v1753_v58  ;;  %v1886_v59 = vld [vmem:[%s3779_s9] sm:$0x1]  ;;  %s3202_s9 = smov [#allocation7]  }
0x15d5   :  { %3072 = vtanh.f32 %v1763_v60 }
0x15dc   :  { %v3071_v2 = vpop.eup %3070 }
0x15dd   :  { %1659 = vrot.lane.b32.xlu0 %v3071_v2, %s3194_s3 }
0x15df   :  { %v3073_v3 = vpop.eup %3072 }
0x15e0   :  { %1766 = vrot.lane.b32.xlu1 %v3073_v3, %s3194_s3 }
0x164f   :  { %v1660_v7 = vpop.permute.xlu0 %1659 }
0x1650   :  { %v1662_v10 = vmul.f32 %v1660_v7, %v1645_v49 }
0x1652   :  { %v1775_v11 = vrot.slane %v1662_v10, 1  ;;  %v1767_v12 = vpop.permute.xlu1 %1766 }
0x1653   :  { %v1769_v14 = vmul.f32 %v1767_v12, %v1749_v8 }
0x1654   :  { %1776 = vrot.lane.b32.xlu1 %v1775_v11, %s3196_s2 }
0x1655   :  { %1771 = vrot.lane.b32.xlu0 %v1769_v14, %s3195_s17  ;;  %v1887_v15 = vrot.slane %v1769_v14, 7 }
0x1659   :  { %1888 = vrot.lane.b32.xlu0 %v1887_v15, %s3195_s17 }
0x16c6   :  { %v1777_v16 = vpop.permute.xlu1 %1776 }
0x16c7   :  { %v1772_v17 = vpop.permute.xlu0 %1771 }
0x16c8   :  { %v1779_v18 = vsel %vm166_vm4, %v1772_v17, %v1777_v16 }
0x16c9   :  { %v1781_v19 = vrot.slane %v1779_v18, 7 }
0x16cb   :  { %v1889_v20 = vpop.permute.xlu0 %1888  ;;  %2746 = vmatmul.mubr.msk.f32.vlgmr.msra.gmra.mrb[18].mxu1 %vm271_vm5, %v1781_v19 }
0x16cc   :  { %2757 = vmatmul.mubr.msk.f32.vlgmr.msra.gmra.mrb[14].mxu0 %vm166_vm4, %v1889_v20  ;;  %2779 = vmatprep.mubr.msk.f32.mxu1 %vm3192_vm0, %v3191_v0 }
0x16cd   :  { %2761 = vmatprep.mubr.msk.f32.mxu0 %vm3192_vm0, %v3191_v0  ;;  %2760 = vmatpush3.msk.msra.mxu0 %vm92_vm1, %v1885_v50 }
0x16ce   :  { %2778 = vmatpush3.msra.mxu1 %v1885_v50  ;;  %2932 = vmatprep.subr.bf16.mxu0 %v3193_v1 }
0x179e   :  { %v1850_v23 = vpop.f32.mrb[18].mxu1 }
0x179f   :  { %v1851_v25 = vadd.f32 %v3114_v24, %v1850_v23  ;;  %v2747_v26 = vpop.f32.mrb[19].mxu1  ;;  %v1958_v27 = vpop.f32.mrb[14].mxu0 }
0x17a0   :  { %v1959_v28 = vadd.f32 %v1958_v27, %v3698_v22  ;;  %v2758_v29 = vpop.f32.mrb[15].mxu0 }
0x17a1   :  { %v2363_v30 = vmul.f32 -1.442695, %v1851_v25 }
0x17a2   :  { %v2365_v31 = vmul.f32 -1.442695, %v1959_v28 }
0x17a3   :  { %3074 = vpow2.f32 %v2363_v30 }
0x17a4   :  { %3076 = vpow2.f32 %v2365_v31 }
0x17a5   :  { %3078 = vtanh.f32 %v1851_v25 }
0x17a6   :  { %3080 = vtanh.f32 %v1959_v28 }
0x17ad   :  { %v3075_v32 = vpop.eup %3074 }
0x17ae   :  { %v3077_v34 = vpop.eup %3076  ;;  %v1857_v36 = vadd.f32 1.0, %v3075_v32 }
0x17af   :  { %v1965_v33 = vadd.f32 1.0, %v3077_v34  ;;  %v3079_v37 = vpop.eup %3078 }
0x17b0   :  { %3082 = vrcp.f32 %v1857_v36  ;;  %v3081_v39 = vpop.eup %3080 }
0x17b1   :  { %3084 = vrcp.f32 %v1965_v33 }
0x17ba   :  { %v3083_v40 = vpop.eup %3082 }
0x17bb   :  { %v3085_v41 = vpop.eup %3084  ;;  %v1861_v43 = vsel %vm64_vm3, %v3083_v40, %v3079_v37 }
0x17bc   :  { %1864 = vrot.lane.b32.xlu1 %v1861_v43, %s3194_s3  ;;  %v1969_v35 = vsel %vm65_vm6, %v3085_v41, %v3081_v39  ;;  %v1862_v48 = vmul.f32 %v1861_v43, %v3660_v57 }
0x17bd   :  { %1971 = vrot.lane.b32.xlu0 %v1969_v35, %s3197_s5 }
0x182e   :  { %v1865_v44 = vpop.permute.xlu1 %1864 }
0x182f   :  { %v1867_v38 = vmul.f32 %v1865_v44, %v1861_v43  ;;  %v1972_v45 = vpop.permute.xlu0 %1971 }
0x1830   :  { %v1974_v46 = vmul.f32 %v1972_v45, %v1969_v35 }
0x1831   :  { %1869 = vrot.lane.b32.xlu1 %v1867_v38, %s3194_s3 }
0x1832   :  { %3086 = vtanh.f32 %v1974_v46 }
0x183c   :  { %v3087_v42 = vpop.eup %3086 }
0x183d   :  { %1977 = vrot.lane.b32.xlu0 %v3087_v42, %s3190_s14 }
0x18a3   :  { %v1870_v47 = vpop.permute.xlu1 %1869 }
0x18a4   :  { %v1872_v49 = vadd.f32 %v1870_v47, %v1862_v48 }
0x18a6   :  { %3088 = vtanh.f32 %v1872_v49 }
0x18af   :  { %v1978_v13 = vpop.permute.xlu0 %1977 }
0x18b0   :  { %v3089_v8 = vpop.eup %3088  ;;  %v1980_v51 = vmul.f32 %v1978_v13, %v1969_v35 }
0x18b1   :  { %1875 = vrot.lane.b32.xlu1 %v3089_v8, %s3194_s3 }
0x18b2   :  { %1982 = vrot.lane.b32.xlu0 %v1980_v51, %s3198_s30 }
0x18b6   :  { %2088 = vrot.lane.b32.xlu0 %v1980_v51, %s3199_s11 }
0x18ba   :  { %2178 = vrot.lane.b32.xlu0 %v1974_v46, %s3200_s12 }
0x1923   :  { %v1876_v52 = vpop.permute.xlu1 %1875 }
0x1924   :  { %v1878_v53 = vmul.f32 %v1876_v52, %v1861_v43  ;;  %v1983_v9 = vpop.permute.xlu0 %1982 }
0x1925   :  { %2762 = vmatmul.mubr.msk.f32.vlgmr.msra.gmra.mrb[16].mxu0 %vm88_vm2, %v1983_v9 }
0x1926   :  { %2085 = vrot.lane.b32.xlu1 %v1878_v53, %s3195_s17  ;;  %2934 = vmatpush3.bf16.msra.mxu0 %v3669_v63 }
0x1927   :  { %2935 = vmatprep.subr.bf16.mxu0 %v3193_v1  ;;  %2774 = vmatprep.mubr.msk.f32.mxu0 %vm3192_vm0, %v3191_v0 }
0x1928   :  { %v2089_v55 = vpop.permute.xlu0 %2088 }
0x192a   :  { %2937 = vmatpush3.bf16.msra.mxu0 %v3681_v6 }
0x192b   :  { %2772 = vmatprep.subr.mxu0 %v3191_v0 }
0x192e   :  { %2773 = vmatpush3.msk.msra.mxu0 %vm92_vm1, %v1883_v54 }
0x1998   :  { %v2086_v56 = vpop.permute.xlu1 %2085 }
0x1999   :  { %v2091_v57 = vsel %vm166_vm4, %v2086_v56, %v2089_v55 }
0x199a   :  { %2775 = vmatmul.mubr.msk.f32.vlgmr.msra.gmra.mrb[18].mxu0 %vm2092_vm7, %v2091_v57 }
0x19f8   :  { %v2055_v1 = vpop.f32.mrb[16].mxu0 }
0x19f9   :  { %v2763_v58 = vpop.f32.mrb[17].mxu0  ;;  %v2056_v60 = vadd.f32 %v2055_v1, %v1886_v59 }
0x19fb   :  { %v2368_v0 = vmul.f32 -1.442695, %v2056_v60 }
0x19fd   :  { %3090 = vpow2.f32 %v2368_v0 }
0x1a07   :  { %v3091_v3 = vpop.eup %3090 }
0x1a08   :  { %v2062_v5 = vadd.f32 1.0, %v3091_v3 }
0x1a6d   :  { %v2165_v61 = vpop.f32.mrb[18].mxu0 }
0x1a6e   :  { %v2166_v62 = vadd.f32 %v2165_v61, %v3698_v22  ;;  %v2776_v63 = vpop.f32.mrb[19].mxu0  ;;  %v2179_v22 = vpop.permute.xlu0 %2178 }
0x1a70   :  { %v2371_v2 = vmul.f32 -1.442695, %v2166_v62 }
0x1a72   :  { %3092 = vpow2.f32 %v2371_v2 }
0x1a73   :  { %3094 = vtanh.f32 %v2166_v62 }
0x1a7c   :  { %v3093_v4 = vpop.eup %3092 }
0x1a7d   :  { %v2172_v6 = vadd.f32 1.0, %v3093_v4  ;;  %v3095_v7 = vpop.eup %3094 }
0x1a7f   :  { %3096 = vrcp.f32 %v2172_v6 }
0x1a80   :  { %3098 = vrcp.f32 %v2062_v5 }
0x1a81   :  { %3100 = vtanh.f32 %v2056_v60 }
0x1a89   :  { %v3097_v10 = vpop.eup %3096 }
0x1a8a   :  { %v2176_v11 = vsel %vm65_vm6, %v3097_v10, %v3095_v7  ;;  %v3099_v12 = vpop.eup %3098 }
0x1a8b   :  { %2183 = vrot.lane.b32.xlu1 %v2176_v11, %s3197_s5  ;;  %v3101_v14 = vpop.eup %3100  ;;  %v2181_v23 = vmul.f32 %v2179_v22, %v2176_v11 }
0x1a8c   :  { %v2066_v15 = vsel %vm65_vm6, %v3099_v12, %v3101_v14 }
0x1a8f   :  { %2068 = vrot.lane.b32.xlu1 %v2066_v15, %s3197_s5 }
0x1afd   :  { %v2184_v16 = vpop.permute.xlu1 %2183 }
0x1afe   :  { %v2186_v17 = vmul.f32 %v2184_v16, %v2176_v11 }
0x1b00   :  { %2188 = vrot.lane.b32.xlu0 %v2186_v17, %s3200_s12 }
0x1b01   :  { %v2069_v18 = vpop.permute.xlu1 %2068 }
0x1b02   :  { %v2071_v19 = vmul.f32 %v2069_v18, %v2066_v15 }
0x1b04   :  { %3102 = vtanh.f32 %v2071_v19 }
0x1b0e   :  { %v3103_v20 = vpop.eup %3102 }
0x1b0f   :  { %2074 = vrot.lane.b32.xlu1 %v3103_v20, %s3190_s14  ;;  %s2320_s14 = sshll.u32 %s3202_s9, 4  ;;  %s2321_s14 = int_to_ptr.vmem [resolvable:$true] %s2320_s14 }
0x1b10   :  { %s3159_s1 = scalar_lea.vmem %s2321_s14, 32  ;;  %p3164_p3 = scmp.lt.s32.totalorder %s2321_s14, %s2321_s14 }
0x1b11   :  { %p3160_p2 = scmp.ne.s32.totalorder %s2321_s14, %s3159_s1  ;;  %p3165_p4 = scmp.lt.s32.totalorder %s3159_s1, %s3159_s1 }
0x1b13   :  { %p3166_p5 = por %p3165_p4, %p3164_p3 }
0x1b15   :  { %p3167_p6 = pnand %p3166_p5, %p3160_p2 }
0x1b72   :  { %v2189_v24 = vpop.permute.xlu0 %2188 }
0x1b73   :  { %v2191_v25 = vadd.f32 %v2189_v24, %v2181_v23 }
0x1b75   :  { %3104 = vtanh.f32 %v2191_v25 }
0x1b7f   :  { %v3105_v26 = vpop.eup %3104 }
0x1b80   :  { %2194 = vrot.lane.b32.xlu0 %v3105_v26, %s3200_s12 }
0x1b81   :  { %v2075_v27 = vpop.permute.xlu1 %2074 }
0x1b82   :  { %v2077_v28 = vmul.f32 %v2075_v27, %v2066_v15 }
0x1b84   :  { %2202 = vrot.lane.b32.xlu0 %v2077_v28, %s3201_s6 }
0x1b88   :  { %2289 = vrot.lane.b32.xlu0 %v2071_v19, %s3200_s12 }
0x1bf2   :  { %v2195_v29 = vpop.permute.xlu0 %2194 }
0x1bf3   :  { %v2197_v30 = vmul.f32 %v2195_v29, %v2176_v11 }
0x1bf5   :  { %2199 = vrot.lane.b32.xlu1 %v2197_v30, %s3198_s30 }
0x1bf6   :  { %v2203_v31 = vpop.permute.xlu0 %2202 }
0x1bfa   :  { %v2290_v46 = vpop.permute.xlu0 %2289 }
0x1c67   :  { %v2200_v32 = vpop.permute.xlu1 %2199 }
0x1c68   :  { %v2205_v34 = vsel %vm88_vm2, %v2200_v32, %v2203_v31 }
0x1c69   :  { %2780 = vmatmul.mubr.msk.f32.vlgmr.msra.gmra.mrb[20].mxu1 %vm2206_vm8, %v2205_v34 }
0x1d3c   :  { %v2276_v36 = vpop.f32.mrb[20].mxu1 }
0x1d3d   :  { %v2277_v33 = vadd.f32 %v2276_v36, %v1886_v59  ;;  %v2781_v37 = vpop.f32.mrb[21].mxu1 }
0x1d3f   :  { %v2373_v39 = vmul.f32 -1.442695, %v2277_v33 }
0x1d41   :  { %3106 = vpow2.f32 %v2373_v39 }
0x1d42   :  { %3108 = vtanh.f32 %v2277_v33 }
0x1d4b   :  { %v3107_v40 = vpop.eup %3106 }
0x1d4c   :  { %v2283_v41 = vadd.f32 1.0, %v3107_v40  ;;  %v3109_v43 = vpop.eup %3108 }
0x1d4e   :  { %3110 = vrcp.f32 %v2283_v41 }
0x1d58   :  { %v3111_v35 = vpop.eup %3110 }
0x1d59   :  { %v2287_v44 = vsel %vm65_vm6, %v3111_v35, %v3109_v43 }
0x1d5a   :  { %2294 = vrot.lane.b32.xlu1 %v2287_v44, %s3197_s5  ;;  %v2292_v42 = vmul.f32 %v2290_v46, %v2287_v44 }
0x1dcc   :  { %v2295_v38 = vpop.permute.xlu1 %2294 }
0x1dcd   :  { %v2297_v45 = vmul.f32 %v2295_v38, %v2287_v44 }
0x1dcf   :  { %2299 = vrot.lane.b32.xlu1 %v2297_v45, %s3200_s12 }
0x1dd3   :  { %2079 = vrot.lane.b32.xlu1 %v2077_v28, %s3198_s30 }
0x1e41   :  { %v2300_v48 = vpop.permute.xlu1 %2299 }
0x1e42   :  { %v2302_v47 = vadd.f32 %v2300_v48, %v2292_v42 }
0x1e44   :  { %3112 = vtanh.f32 %v2302_v47 }
0x1e45   :  { %v2080_v49 = vpop.permute.xlu1 %2079 }
0x1e46   :  { %2083 = vst.msk [vmem:[#allocation7] sm:$0x1] %vm2082_vm9, %v2080_v49 }
0x1e4e   :  { %v3113_v50 = vpop.eup %3112 }
0x1e4f   :  { %2305 = vrot.lane.b32.xlu0 %v3113_v50, %s3200_s12 }
0x1ec1   :  { %v2306_v21 = vpop.permute.xlu0 %2305 }
0x1ec2   :  { %v2308_v13 = vmul.f32 %v2306_v21, %v2287_v44 }
0x1ec4   :  { %2310 = vrot.lane.b32.xlu0 %v2308_v13, %s3198_s30 }
0x1f36   :  { %v2311_v8 = vpop.permute.xlu0 %2310 }
0x1f37   :  { %2313 = vst.msk [vmem:[#allocation7 + $0x1] sm:$0x1] %vm2082_vm9, %v2311_v8 }
0x1f38   :  { %3170 = shalt.err (!%p3167_p6)
}
0x1f39   :  { %s3171_s18 = scalar_lea.hbm %s3780_s10, 32 }
0x1f3a   :  { %p3172_p7 = scmp.ne.s32.totalorder %s3780_s10, %s3171_s18  ;;  %p3175_p8 = scmp.lt.u32.totalorder %s3171_s18, %s3780_s10 }
0x1f3c   :  { %p3177_p9 = pnand %p3175_p8, %p3172_p7 }
0x1f3e   :  { %3180 = shalt.err (!%p3177_p9)
}
0x1f3f   :  { %2323 = dma.vmem_to_hbm [thread:$0]  %s2321_s14, 32, %s3780_s10, [#allocation4]  }
0x1f40   :  { %3185 = dma.done.wait [#allocation4], 32  }
0x1f41   :  { %3186 = vsyncadd [#allocation4], 4294967264 }
0x1f42   :  { %2327 = vsyncpa [#allocation3], 1 }
0x1f43   :  { %2328 = vsyncpa [#allocation6], 1 }
0x1f44   :  { %2329 = vsyncpa [#allocation4], 1 }

</bundles_post_ra>
